<compile_context>
chip_gen: v5e
topology: v5e:2x2
jax: 0.10.0
libtpu: 0.0.40
codegen_flags: <defaults>
</compile_context>

<pallas_src>
import functools

import jax
import jax.numpy as jnp
from jax import lax
from jax.experimental import pallas as pl
from jax.experimental.pallas import tpu as pltpu

EPS = 1e-5

# Row layout of the packed small-parameter array (see pack_params()).
(ROW_BNIN_G, ROW_BNIN_B, ROW_BNIN_M, ROW_BNIN_V,
 ROW_BP, ROW_BQKV, ROW_BO,
 ROW_LN1_G, ROW_LN1_B,
 ROW_BFF1, ROW_BFF2,
 ROW_LN2_G, ROW_LN2_B,
 ROW_BNT_G, ROW_BNT_B, ROW_BNT_M, ROW_BNT_V,
 ROW_B1, ROW_W2, ROW_W3, ROW_B2, ROW_B3) = range(22)
NUM_VEC_ROWS = 24  # 22 rounded up to a sublane multiple (8)


def _layernorm(x, g, b):
    mu = jnp.mean(x, axis=-1, keepdims=True)
    var = jnp.mean((x - mu) ** 2, axis=-1, keepdims=True)
    return (x - mu) * lax.rsqrt(var + EPS) * g + b


def _batchnorm_eval(x, g, b, m, v):
    return (x - m) * lax.rsqrt(v + EPS) * g + b


def single_layer_model_kernel(
    x_ref, wp_ref, wqkv_ref, wo_ref, wff1_ref, wff2_ref, w1_ref, vec_ref,
    o_ref, *, nhead,
):
    C = wp_ref.shape[0]
    D = wp_ref.shape[1]
    dff = wff1_ref.shape[1]
    dhead_in = w1_ref.shape[1]
    dh = D // nhead
    scale = 1.0 / (dh ** 0.5)

    def vrow(r, n):               # (1, n) slice of the packed small params (f32)
        return vec_ref[r:r + 1, :n]

    def mm(a_f32, w_ref):
        # bf16 operands, f32 accumulation on the MXU.
        return jnp.dot(a_f32.astype(jnp.bfloat16), w_ref[...],
                       preferred_element_type=jnp.float32)

    x = x_ref[0].astype(jnp.float32)                                   # (L, C)

    # norm_input: BatchNorm1d(dim_input), eval mode (running stats).
    x = _batchnorm_eval(x, vrow(ROW_BNIN_G, C), vrow(ROW_BNIN_B, C),
                        vrow(ROW_BNIN_M, C), vrow(ROW_BNIN_V, C))

    # TransformerWrapper projection: Linear(dim_input -> dim_transformer).
    h = mm(x, wp_ref) + vrow(ROW_BP, D)                                # (L, D)

    # --- nn.TransformerEncoderLayer (post-norm, ReLU FFN, dropout=identity) ---
    # Fused Q/K/V projection: single (L, D) x (D, 3D) matmul.
    qkv = mm(h, wqkv_ref) + vrow(ROW_BQKV, 3 * D)                      # (L, 3D)
    q = qkv[:, 0:D]
    k = qkv[:, D:2 * D]
    v = qkv[:, 2 * D:3 * D]

    # Per-head attention over dh-wide slices (unrolled; nhead is small).
    ctx_parts = []
    for hh in range(nhead):
        lo = hh * dh
        qh = q[:, lo:lo + dh].astype(jnp.bfloat16)                     # (L, dh)
        kh = k[:, lo:lo + dh].astype(jnp.bfloat16)
        vh = v[:, lo:lo + dh].astype(jnp.bfloat16)
        s = lax.dot_general(qh, kh, (((1,), (1,)), ((), ())),
                            preferred_element_type=jnp.float32) * scale  # (L, L) f32
        s = s - jnp.max(s, axis=-1, keepdims=True)
        p = jnp.exp(s)
        p = p * pl.reciprocal(jnp.sum(p, axis=-1, keepdims=True), approx=True)
        ctx_parts.append(jnp.dot(p.astype(jnp.bfloat16), vh,
                                 preferred_element_type=jnp.float32))  # (L, dh)
    ctx = jnp.concatenate(ctx_parts, axis=-1)                          # (L, D)

    attn = mm(ctx, wo_ref) + vrow(ROW_BO, D)
    h = _layernorm(h + attn, vrow(ROW_LN1_G, D), vrow(ROW_LN1_B, D))

    # Feed-forward block.
    f = jnp.maximum(mm(h, wff1_ref) + vrow(ROW_BFF1, dff), 0.0)
    f = mm(f, wff2_ref) + vrow(ROW_BFF2, D)
    h = _layernorm(h + f, vrow(ROW_LN2_G, D), vrow(ROW_LN2_B, D))

    # norm_trans: BatchNorm1d(dim_transformer), eval mode.
    h = _batchnorm_eval(h, vrow(ROW_BNT_G, D), vrow(ROW_BNT_B, D),
                        vrow(ROW_BNT_M, D), vrow(ROW_BNT_V, D))

    # --- PoolAttFF: attention pooling over L within the sequence ---
    a = jnp.maximum(mm(h, w1_ref) + vrow(ROW_B1, dhead_in), 0.0)       # (L, dhead_in)
    # Lin2 (dhead_in -> 1) as a VPU multiply + lane reduction (no 1-row matmul).
    logits = jnp.sum(a * vrow(ROW_W2, dhead_in), axis=-1, keepdims=True)
    logits = logits + vec_ref[ROW_B2:ROW_B2 + 1, 0:1]                  # (L, 1)
    logits = logits - jnp.max(logits, axis=0, keepdims=True)
    e = jnp.exp(logits)
    att = e * pl.reciprocal(jnp.sum(e, axis=0, keepdims=True), approx=True)  # (L, 1)
    pooled = jnp.sum(att * h, axis=0, keepdims=True)                   # (1, D)

    # Lin3 (D -> 1) as a VPU multiply + lane reduction.
    out = jnp.sum(pooled * vrow(ROW_W3, D), axis=-1, keepdims=True)
    out = out + vec_ref[ROW_B3:ROW_B3 + 1, 0:1]                        # (1, 1)
    sig = 1.0 / (1.0 + jnp.exp(-out))                                  # exact sigmoid

    # Lane-dense, (8,128)-aligned output block; the wrapper slices [0, 0].
    o_ref[...] = jnp.broadcast_to(sig, o_ref.shape).astype(o_ref.dtype)


def pack_params(params):
    """One-time host-side packing: pre-transpose matmul weights, cast them to
    bf16, fuse Q/K/V, and pack the small (1, dim) vectors into a single
    (NUM_VEC_ROWS, width) f32 array."""
    wq, wk, wv = params["wq"], params["wk"], params["wv"]
    D = wq.shape[0]
    C = params["wp"].shape[1]
    dff = params["wff1"].shape[0]
    dhead_in = params["w1"].shape[0]
    width = max(128, -(-max(C, 3 * D, dff, dhead_in) // 128) * 128)

    def row(v):
        v = jnp.asarray(v, jnp.float32).reshape(-1)
        return jnp.pad(v, (0, width - v.shape[0]))

    rows = [jnp.zeros((width,), jnp.float32)] * NUM_VEC_ROWS
    rows[ROW_BNIN_G] = row(params["bnin_g"])
    rows[ROW_BNIN_B] = row(params["bnin_b"])
    rows[ROW_BNIN_M] = row(params["bnin_m"])
    rows[ROW_BNIN_V] = row(params["bnin_v"])
    rows[ROW_BP] = row(params["bp"])
    rows[ROW_BQKV] = row(jnp.concatenate(
        [params["bq"].reshape(-1), params["bk"].reshape(-1), params["bv"].reshape(-1)]))
    rows[ROW_BO] = row(params["bo"])
    rows[ROW_LN1_G] = row(params["ln1_g"])
    rows[ROW_LN1_B] = row(params["ln1_b"])
    rows[ROW_BFF1] = row(params["bff1"])
    rows[ROW_BFF2] = row(params["bff2"])
    rows[ROW_LN2_G] = row(params["ln2_g"])
    rows[ROW_LN2_B] = row(params["ln2_b"])
    rows[ROW_BNT_G] = row(params["bnt_g"])
    rows[ROW_BNT_B] = row(params["bnt_b"])
    rows[ROW_BNT_M] = row(params["bnt_m"])
    rows[ROW_BNT_V] = row(params["bnt_v"])
    rows[ROW_B1] = row(params["b1"])
    rows[ROW_W2] = row(params["w2"])
    rows[ROW_W3] = row(params["w3"])
    rows[ROW_B2] = row(params["b2"])
    rows[ROW_B3] = row(params["b3"])
    vecs = jnp.stack(rows, axis=0)                                     # (24, width) f32

    def wt(w):  # pre-transpose + bf16 for the MXU
        return jnp.asarray(w, jnp.float32).T.astype(jnp.bfloat16)

    return {
        "wp_t": wt(params["wp"]),                                      # (C, D)   bf16
        "wqkv_t": wt(jnp.concatenate([wq, wk, wv], axis=0)),           # (D, 3D)  bf16
        "wo_t": wt(params["wo"]),                                      # (D, D)   bf16
        "wff1_t": wt(params["wff1"]),                                  # (D, dff) bf16
        "wff2_t": wt(params["wff2"]),                                  # (dff, D) bf16
        "w1_t": wt(params["w1"]),                                      # (D, dhead_in) bf16
        "vecs": vecs,
    }


def single_layer_model(features, packed, *, nhead):
    """features: (N, L, C) float32 -> (N,) float32 (eval-mode forward)."""
    N, L, C = features.shape
    weights = [packed["wp_t"], packed["wqkv_t"], packed["wo_t"],
               packed["wff1_t"], packed["wff2_t"], packed["w1_t"], packed["vecs"]]

    def const_spec(arr):
        nd = arr.ndim
        return pl.BlockSpec(arr.shape, lambda i, _nd=nd: (0,) * _nd)

    in_specs = ([pl.BlockSpec((1, L, C), lambda i: (i, 0, 0))]
                + [const_spec(w) for w in weights])

    out = pl.pallas_call(
        functools.partial(single_layer_model_kernel, nhead=nhead),
        out_shape=jax.ShapeDtypeStruct((N, 8, 128), jnp.float32),
        grid=(N,),
        in_specs=in_specs,
        out_specs=pl.BlockSpec((1, 8, 128), lambda i: (i, 0, 0)),
        compiler_params=pltpu.CompilerParams(
            dimension_semantics=("parallel",)),     # shard sequences across v7x cores
    )(features, *weights)
    # PyTorch: pool(x) -> (N, 1); .squeeze(-1) -> (N,)
    return out[:, 0, 0]


def init_params(key, C, D, nhead, dff, dhead_in):
    keys = iter(jax.random.split(key, 64))

    def nrm(shape, scale=0.1):
        return scale * jax.random.normal(next(keys), shape, dtype=jnp.float32)

    def pos(shape):
        return 0.5 + jax.random.uniform(next(keys), shape, dtype=jnp.float32)

    return {
        # BatchNorm1d(dim_input)
        "bnin_g": 1.0 + nrm((1, C)), "bnin_b": nrm((1, C)),
        "bnin_m": nrm((1, C)), "bnin_v": pos((1, C)),
        # TransformerWrapper projection
        "wp": nrm((D, C)), "bp": nrm((1, D)),
        # Self-attention (in_proj split into Q/K/V) + out_proj
        "wq": nrm((D, D)), "bq": nrm((1, D)),
        "wk": nrm((D, D)), "bk": nrm((1, D)),
        "wv": nrm((D, D)), "bv": nrm((1, D)),
        "wo": nrm((D, D)), "bo": nrm((1, D)),
        # LayerNorms
        "ln1_g": 1.0 + nrm((1, D)), "ln1_b": nrm((1, D)),
        # FFN
        "wff1": nrm((dff, D)), "bff1": nrm((1, dff)),
        "wff2": nrm((D, dff)), "bff2": nrm((1, D)),
        "ln2_g": 1.0 + nrm((1, D)), "ln2_b": nrm((1, D)),
        # BatchNorm1d(dim_transformer)
        "bnt_g": 1.0 + nrm((1, D)), "bnt_b": nrm((1, D)),
        "bnt_m": nrm((1, D)), "bnt_v": pos((1, D)),
        # PoolAttFF
        "w1": nrm((dhead_in, D)), "b1": nrm((1, dhead_in)),
        "w2": nrm((1, dhead_in)), "b2": nrm((1, 1)),
        "w3": nrm((1, D)), "b3": nrm((1, 1)),
    }


def ref_forward(x, p, nhead):
    """Pure-JAX f32 reference mirroring the PyTorch module (eval mode)."""
    def bn(x, g, b, m, v):
        return (x - m) * lax.rsqrt(v + EPS) * g + b

    def ln(x, g, b):
        mu = x.mean(-1, keepdims=True)
        var = ((x - mu) ** 2).mean(-1, keepdims=True)
        return (x - mu) * lax.rsqrt(var + EPS) * g + b

    x = bn(x, p["bnin_g"], p["bnin_b"], p["bnin_m"], p["bnin_v"])
    h = x @ p["wp"].T + p["bp"]
    q = h @ p["wq"].T + p["bq"]
    k = h @ p["wk"].T + p["bk"]
    v = h @ p["wv"].T + p["bv"]
    N, L, D = h.shape
    dh = D // nhead
    qh = q.reshape(N, L, nhead, dh).transpose(0, 2, 1, 3)
    kh = k.reshape(N, L, nhead, dh).transpose(0, 2, 1, 3)
    vh = v.reshape(N, L, nhead, dh).transpose(0, 2, 1, 3)
    s = jnp.einsum("nhld,nhmd->nhlm", qh, kh) * (1.0 / (dh ** 0.5))
    a = jax.nn.softmax(s, axis=-1)
    o = jnp.einsum("nhlm,nhmd->nhld", a, vh).transpose(0, 2, 1, 3).reshape(N, L, D)
    o = o @ p["wo"].T + p["bo"]
    h = ln(h + o, p["ln1_g"], p["ln1_b"])
    f = jax.nn.relu(h @ p["wff1"].T + p["bff1"]) @ p["wff2"].T + p["bff2"]
    h = ln(h + f, p["ln2_g"], p["ln2_b"])
    h = bn(h, p["bnt_g"], p["bnt_b"], p["bnt_m"], p["bnt_v"])
    att = jax.nn.relu(h @ p["w1"].T + p["b1"]) @ p["w2"].T + p["b2"]   # (N, L, 1)
    att = jax.nn.softmax(att, axis=1)
    pooled = jnp.sum(att * h, axis=1)                                   # (N, D)
    out = pooled @ p["w3"].T + p["b3"]                                  # (N, 1)
    return jax.nn.sigmoid(out)[:, 0]


if __name__ == "__main__":
    # Small synthetic config:
    #   dim_input=64, dim_transformer=64, nhead=4, dim_feedforward=128, dim_head_in=128
    N, L, C = 2, 16, 64
    D, NHEAD, DFF, DHEAD_IN = 64, 4, 128, 128

    key = jax.random.PRNGKey(0)
    k_x, k_p = jax.random.split(key)
    features = jax.random.normal(k_x, (N, L, C), dtype=jnp.float32)
    params = init_params(k_p, C, D, NHEAD, DFF, DHEAD_IN)

    packed = pack_params(params)          # one-time host-side weight prep
    out = jax.block_until_ready(single_layer_model(features, packed, nhead=NHEAD))

    ref = jax.block_until_ready(ref_forward(features, params, NHEAD))
    assert out.shape == (N,)
    assert jnp.all(jnp.isfinite(out))
    # Tolerance absorbs the intentional bf16 matmul operands (f32 accumulation)
    # and the approximate EUP reciprocals in the two softmax normalisations.
    assert jnp.allclose(out, ref, rtol=2e-2, atol=2e-2), (out, ref)

    print("KERNEL_OK")
</pallas_src>

<mosaic_0001>
module attributes {stable_mosaic.version = 11 : i64} {
  func.func @single_layer_model_kernel(%arg0: i32, %arg1: memref<1x16x64xf32, #tpu.memory_space<vmem>>, %arg2: memref<64x64xbf16, #tpu.memory_space<vmem>>, %arg3: memref<64x192xbf16, #tpu.memory_space<vmem>>, %arg4: memref<64x64xbf16, #tpu.memory_space<vmem>>, %arg5: memref<64x128xbf16, #tpu.memory_space<vmem>>, %arg6: memref<128x64xbf16, #tpu.memory_space<vmem>>, %arg7: memref<64x128xbf16, #tpu.memory_space<vmem>>, %arg8: memref<24x256xf32, #tpu.memory_space<vmem>>, %arg9: memref<1x8x128xf32, #tpu.memory_space<vmem>>) attributes {dimension_semantics = [#tpu.dimension_semantics<parallel>], iteration_bounds = array<i64: 2>, scalar_prefetch = 0 : i64, scratch_operands = 0 : i64, tpu.core_type = #tpu.core_type<tc>, window_params = [{transform_indices = @transform_0, window_bounds = array<i64: 1, 16, 64>}, {pipeline_mode = #tpu.pipeline_mode<synchronous>, transform_indices = @transform_1, window_bounds = array<i64: 64, 64>}, {pipeline_mode = #tpu.pipeline_mode<synchronous>, transform_indices = @transform_2, window_bounds = array<i64: 64, 192>}, {pipeline_mode = #tpu.pipeline_mode<synchronous>, transform_indices = @transform_3, window_bounds = array<i64: 64, 64>}, {pipeline_mode = #tpu.pipeline_mode<synchronous>, transform_indices = @transform_4, window_bounds = array<i64: 64, 128>}, {pipeline_mode = #tpu.pipeline_mode<synchronous>, transform_indices = @transform_5, window_bounds = array<i64: 128, 64>}, {pipeline_mode = #tpu.pipeline_mode<synchronous>, transform_indices = @transform_6, window_bounds = array<i64: 64, 128>}, {pipeline_mode = #tpu.pipeline_mode<synchronous>, transform_indices = @transform_7, window_bounds = array<i64: 24, 256>}, {transform_indices = @transform_8, window_bounds = array<i64: 1, 8, 128>}]} {
    %c0 = arith.constant 0 : index
    %c0_0 = arith.constant 0 : index
    %c0_1 = arith.constant 0 : index
    %0 = vector.load %arg1[%c0, %c0_0, %c0_1] : memref<1x16x64xf32, #tpu.memory_space<vmem>>, vector<1x16x64xf32>
    %1 = vector.shape_cast %0 : vector<1x16x64xf32> to vector<16x64xf32>
    %c0_2 = arith.constant 0 : index
    %c0_3 = arith.constant 0 : index
    %2 = vector.load %arg8[%c0_2, %c0_3] : memref<24x256xf32, #tpu.memory_space<vmem>>, vector<1x64xf32>
    %c1 = arith.constant 1 : index
    %c0_4 = arith.constant 0 : index
    %3 = vector.load %arg8[%c1, %c0_4] : memref<24x256xf32, #tpu.memory_space<vmem>>, vector<1x64xf32>
    %c2 = arith.constant 2 : index
    %c0_5 = arith.constant 0 : index
    %4 = vector.load %arg8[%c2, %c0_5] : memref<24x256xf32, #tpu.memory_space<vmem>>, vector<1x64xf32>
    %c3 = arith.constant 3 : index
    %c0_6 = arith.constant 0 : index
    %5 = vector.load %arg8[%c3, %c0_6] : memref<24x256xf32, #tpu.memory_space<vmem>>, vector<1x64xf32>
    %6 = vector.broadcast %4 : vector<1x64xf32> to vector<16x64xf32>
    %7 = arith.subf %1, %6 : vector<16x64xf32>
    %cst = arith.constant 9.99999974E-6 : f32
    %8 = vector.broadcast %cst : f32 to vector<1x64xf32>
    %9 = arith.addf %5, %8 : vector<1x64xf32>
    %10 = math.rsqrt %9 : vector<1x64xf32>
    %11 = vector.broadcast %10 : vector<1x64xf32> to vector<16x64xf32>
    %12 = arith.mulf %7, %11 : vector<16x64xf32>
    %13 = vector.broadcast %2 : vector<1x64xf32> to vector<16x64xf32>
    %14 = arith.mulf %12, %13 : vector<16x64xf32>
    %15 = vector.broadcast %3 : vector<1x64xf32> to vector<16x64xf32>
    %16 = arith.addf %14, %15 : vector<16x64xf32>
    %17 = arith.truncf %16 : vector<16x64xf32> to vector<16x64xbf16>
    %c0_7 = arith.constant 0 : index
    %c0_8 = arith.constant 0 : index
    %18 = vector.load %arg2[%c0_7, %c0_8] : memref<64x64xbf16, #tpu.memory_space<vmem>>, vector<64x64xbf16>
    %cst_9 = arith.constant dense<0.000000e+00> : vector<16x64xf32>
    %19 = tpu.matmul %17, %18, %cst_9 {dimension_numbers = #tpu.dot_dimension_numbers<[1], [0], [0], [1], [0, 0, 1, 1], [], []>} : vector<16x64xbf16>, vector<64x64xbf16>, vector<16x64xf32> -> vector<16x64xf32>
    %c4 = arith.constant 4 : index
    %c0_10 = arith.constant 0 : index
    %20 = vector.load %arg8[%c4, %c0_10] : memref<24x256xf32, #tpu.memory_space<vmem>>, vector<1x64xf32>
    %21 = vector.broadcast %20 : vector<1x64xf32> to vector<16x64xf32>
    %22 = arith.addf %19, %21 : vector<16x64xf32>
    %23 = arith.truncf %22 : vector<16x64xf32> to vector<16x64xbf16>
    %c0_11 = arith.constant 0 : index
    %c0_12 = arith.constant 0 : index
    %24 = vector.load %arg3[%c0_11, %c0_12] : memref<64x192xbf16, #tpu.memory_space<vmem>>, vector<64x192xbf16>
    %cst_13 = arith.constant dense<0.000000e+00> : vector<16x192xf32>
    %25 = tpu.matmul %23, %24, %cst_13 {dimension_numbers = #tpu.dot_dimension_numbers<[1], [0], [0], [1], [0, 0, 1, 1], [], []>} : vector<16x64xbf16>, vector<64x192xbf16>, vector<16x192xf32> -> vector<16x192xf32>
    %c5 = arith.constant 5 : index
    %c0_14 = arith.constant 0 : index
    %26 = vector.load %arg8[%c5, %c0_14] : memref<24x256xf32, #tpu.memory_space<vmem>>, vector<1x192xf32>
    %27 = vector.broadcast %26 : vector<1x192xf32> to vector<16x192xf32>
    %28 = arith.addf %25, %27 : vector<16x192xf32>
    %29 = vector.extract_strided_slice %28 {offsets = [0, 0], sizes = [16, 64], strides = [1, 1]} : vector<16x192xf32> to vector<16x64xf32>
    %30 = vector.extract_strided_slice %28 {offsets = [0, 64], sizes = [16, 64], strides = [1, 1]} : vector<16x192xf32> to vector<16x64xf32>
    %31 = vector.extract_strided_slice %28 {offsets = [0, 128], sizes = [16, 64], strides = [1, 1]} : vector<16x192xf32> to vector<16x64xf32>
    %32 = vector.extract_strided_slice %29 {offsets = [0, 0], sizes = [16, 16], strides = [1, 1]} : vector<16x64xf32> to vector<16x16xf32>
    %33 = arith.truncf %32 : vector<16x16xf32> to vector<16x16xbf16>
    %34 = vector.extract_strided_slice %30 {offsets = [0, 0], sizes = [16, 16], strides = [1, 1]} : vector<16x64xf32> to vector<16x16xf32>
    %35 = arith.truncf %34 : vector<16x16xf32> to vector<16x16xbf16>
    %36 = vector.extract_strided_slice %31 {offsets = [0, 0], sizes = [16, 16], strides = [1, 1]} : vector<16x64xf32> to vector<16x16xf32>
    %37 = arith.truncf %36 : vector<16x16xf32> to vector<16x16xbf16>
    %cst_15 = arith.constant dense<0.000000e+00> : vector<16x16xf32>
    %38 = tpu.matmul %33, %35, %cst_15 {dimension_numbers = #tpu.dot_dimension_numbers<[1], [1], [0], [0], [0, 0, 1, 0], [], []>} : vector<16x16xbf16>, vector<16x16xbf16>, vector<16x16xf32> -> vector<16x16xf32>
    %cst_16 = arith.constant 2.500000e-01 : f32
    %39 = vector.broadcast %cst_16 : f32 to vector<16x16xf32>
    %40 = arith.mulf %38, %39 : vector<16x16xf32>
    %cst_17 = arith.constant dense<0xFF800000> : vector<16xf32>
    %41 = vector.multi_reduction <maximumf>, %40, %cst_17 [1] : vector<16x16xf32> to vector<16xf32>
    %42 = vector.shape_cast %41 : vector<16xf32> to vector<16x1xf32>
    %43 = vector.broadcast %42 : vector<16x1xf32> to vector<16x16xf32>
    %44 = arith.subf %40, %43 : vector<16x16xf32>
    %45 = math.exp %44 : vector<16x16xf32>
    %cst_18 = arith.constant dense<0.000000e+00> : vector<16xf32>
    %46 = vector.multi_reduction <add>, %45, %cst_18 [1] : vector<16x16xf32> to vector<16xf32>
    %47 = vector.shape_cast %46 : vector<16xf32> to vector<16x1xf32>
    %48 = tpu.reciprocal %47 {approx = true} : vector<16x1xf32> -> vector<16x1xf32>
    %49 = vector.broadcast %48 : vector<16x1xf32> to vector<16x16xf32>
    %50 = arith.mulf %45, %49 : vector<16x16xf32>
    %51 = arith.truncf %50 : vector<16x16xf32> to vector<16x16xbf16>
    %cst_19 = arith.constant dense<0.000000e+00> : vector<16x16xf32>
    %52 = tpu.matmul %51, %37, %cst_19 {dimension_numbers = #tpu.dot_dimension_numbers<[1], [0], [0], [1], [0, 0, 1, 1], [], []>} : vector<16x16xbf16>, vector<16x16xbf16>, vector<16x16xf32> -> vector<16x16xf32>
    %53 = vector.extract_strided_slice %29 {offsets = [0, 16], sizes = [16, 16], strides = [1, 1]} : vector<16x64xf32> to vector<16x16xf32>
    %54 = arith.truncf %53 : vector<16x16xf32> to vector<16x16xbf16>
    %55 = vector.extract_strided_slice %30 {offsets = [0, 16], sizes = [16, 16], strides = [1, 1]} : vector<16x64xf32> to vector<16x16xf32>
    %56 = arith.truncf %55 : vector<16x16xf32> to vector<16x16xbf16>
    %57 = vector.extract_strided_slice %31 {offsets = [0, 16], sizes = [16, 16], strides = [1, 1]} : vector<16x64xf32> to vector<16x16xf32>
    %58 = arith.truncf %57 : vector<16x16xf32> to vector<16x16xbf16>
    %cst_20 = arith.constant dense<0.000000e+00> : vector<16x16xf32>
    %59 = tpu.matmul %54, %56, %cst_20 {dimension_numbers = #tpu.dot_dimension_numbers<[1], [1], [0], [0], [0, 0, 1, 0], [], []>} : vector<16x16xbf16>, vector<16x16xbf16>, vector<16x16xf32> -> vector<16x16xf32>
    %cst_21 = arith.constant 2.500000e-01 : f32
    %60 = vector.broadcast %cst_21 : f32 to vector<16x16xf32>
    %61 = arith.mulf %59, %60 : vector<16x16xf32>
    %cst_22 = arith.constant dense<0xFF800000> : vector<16xf32>
    %62 = vector.multi_reduction <maximumf>, %61, %cst_22 [1] : vector<16x16xf32> to vector<16xf32>
    %63 = vector.shape_cast %62 : vector<16xf32> to vector<16x1xf32>
    %64 = vector.broadcast %63 : vector<16x1xf32> to vector<16x16xf32>
    %65 = arith.subf %61, %64 : vector<16x16xf32>
    %66 = math.exp %65 : vector<16x16xf32>
    %cst_23 = arith.constant dense<0.000000e+00> : vector<16xf32>
    %67 = vector.multi_reduction <add>, %66, %cst_23 [1] : vector<16x16xf32> to vector<16xf32>
    %68 = vector.shape_cast %67 : vector<16xf32> to vector<16x1xf32>
    %69 = tpu.reciprocal %68 {approx = true} : vector<16x1xf32> -> vector<16x1xf32>
    %70 = vector.broadcast %69 : vector<16x1xf32> to vector<16x16xf32>
    %71 = arith.mulf %66, %70 : vector<16x16xf32>
    %72 = arith.truncf %71 : vector<16x16xf32> to vector<16x16xbf16>
    %cst_24 = arith.constant dense<0.000000e+00> : vector<16x16xf32>
    %73 = tpu.matmul %72, %58, %cst_24 {dimension_numbers = #tpu.dot_dimension_numbers<[1], [0], [0], [1], [0, 0, 1, 1], [], []>} : vector<16x16xbf16>, vector<16x16xbf16>, vector<16x16xf32> -> vector<16x16xf32>
    %74 = vector.extract_strided_slice %29 {offsets = [0, 32], sizes = [16, 16], strides = [1, 1]} : vector<16x64xf32> to vector<16x16xf32>
    %75 = arith.truncf %74 : vector<16x16xf32> to vector<16x16xbf16>
    %76 = vector.extract_strided_slice %30 {offsets = [0, 32], sizes = [16, 16], strides = [1, 1]} : vector<16x64xf32> to vector<16x16xf32>
    %77 = arith.truncf %76 : vector<16x16xf32> to vector<16x16xbf16>
    %78 = vector.extract_strided_slice %31 {offsets = [0, 32], sizes = [16, 16], strides = [1, 1]} : vector<16x64xf32> to vector<16x16xf32>
    %79 = arith.truncf %78 : vector<16x16xf32> to vector<16x16xbf16>
    %cst_25 = arith.constant dense<0.000000e+00> : vector<16x16xf32>
    %80 = tpu.matmul %75, %77, %cst_25 {dimension_numbers = #tpu.dot_dimension_numbers<[1], [1], [0], [0], [0, 0, 1, 0], [], []>} : vector<16x16xbf16>, vector<16x16xbf16>, vector<16x16xf32> -> vector<16x16xf32>
    %cst_26 = arith.constant 2.500000e-01 : f32
    %81 = vector.broadcast %cst_26 : f32 to vector<16x16xf32>
    %82 = arith.mulf %80, %81 : vector<16x16xf32>
    %cst_27 = arith.constant dense<0xFF800000> : vector<16xf32>
    %83 = vector.multi_reduction <maximumf>, %82, %cst_27 [1] : vector<16x16xf32> to vector<16xf32>
    %84 = vector.shape_cast %83 : vector<16xf32> to vector<16x1xf32>
    %85 = vector.broadcast %84 : vector<16x1xf32> to vector<16x16xf32>
    %86 = arith.subf %82, %85 : vector<16x16xf32>
    %87 = math.exp %86 : vector<16x16xf32>
    %cst_28 = arith.constant dense<0.000000e+00> : vector<16xf32>
    %88 = vector.multi_reduction <add>, %87, %cst_28 [1] : vector<16x16xf32> to vector<16xf32>
    %89 = vector.shape_cast %88 : vector<16xf32> to vector<16x1xf32>
    %90 = tpu.reciprocal %89 {approx = true} : vector<16x1xf32> -> vector<16x1xf32>
    %91 = vector.broadcast %90 : vector<16x1xf32> to vector<16x16xf32>
    %92 = arith.mulf %87, %91 : vector<16x16xf32>
    %93 = arith.truncf %92 : vector<16x16xf32> to vector<16x16xbf16>
    %cst_29 = arith.constant dense<0.000000e+00> : vector<16x16xf32>
    %94 = tpu.matmul %93, %79, %cst_29 {dimension_numbers = #tpu.dot_dimension_numbers<[1], [0], [0], [1], [0, 0, 1, 1], [], []>} : vector<16x16xbf16>, vector<16x16xbf16>, vector<16x16xf32> -> vector<16x16xf32>
    %95 = vector.extract_strided_slice %29 {offsets = [0, 48], sizes = [16, 16], strides = [1, 1]} : vector<16x64xf32> to vector<16x16xf32>
    %96 = arith.truncf %95 : vector<16x16xf32> to vector<16x16xbf16>
    %97 = vector.extract_strided_slice %30 {offsets = [0, 48], sizes = [16, 16], strides = [1, 1]} : vector<16x64xf32> to vector<16x16xf32>
    %98 = arith.truncf %97 : vector<16x16xf32> to vector<16x16xbf16>
    %99 = vector.extract_strided_slice %31 {offsets = [0, 48], sizes = [16, 16], strides = [1, 1]} : vector<16x64xf32> to vector<16x16xf32>
    %100 = arith.truncf %99 : vector<16x16xf32> to vector<16x16xbf16>
    %cst_30 = arith.constant dense<0.000000e+00> : vector<16x16xf32>
    %101 = tpu.matmul %96, %98, %cst_30 {dimension_numbers = #tpu.dot_dimension_numbers<[1], [1], [0], [0], [0, 0, 1, 0], [], []>} : vector<16x16xbf16>, vector<16x16xbf16>, vector<16x16xf32> -> vector<16x16xf32>
    %cst_31 = arith.constant 2.500000e-01 : f32
    %102 = vector.broadcast %cst_31 : f32 to vector<16x16xf32>
    %103 = arith.mulf %101, %102 : vector<16x16xf32>
    %cst_32 = arith.constant dense<0xFF800000> : vector<16xf32>
    %104 = vector.multi_reduction <maximumf>, %103, %cst_32 [1] : vector<16x16xf32> to vector<16xf32>
    %105 = vector.shape_cast %104 : vector<16xf32> to vector<16x1xf32>
    %106 = vector.broadcast %105 : vector<16x1xf32> to vector<16x16xf32>
    %107 = arith.subf %103, %106 : vector<16x16xf32>
    %108 = math.exp %107 : vector<16x16xf32>
    %cst_33 = arith.constant dense<0.000000e+00> : vector<16xf32>
    %109 = vector.multi_reduction <add>, %108, %cst_33 [1] : vector<16x16xf32> to vector<16xf32>
    %110 = vector.shape_cast %109 : vector<16xf32> to vector<16x1xf32>
    %111 = tpu.reciprocal %110 {approx = true} : vector<16x1xf32> -> vector<16x1xf32>
    %112 = vector.broadcast %111 : vector<16x1xf32> to vector<16x16xf32>
    %113 = arith.mulf %108, %112 : vector<16x16xf32>
    %114 = arith.truncf %113 : vector<16x16xf32> to vector<16x16xbf16>
    %cst_34 = arith.constant dense<0.000000e+00> : vector<16x16xf32>
    %115 = tpu.matmul %114, %100, %cst_34 {dimension_numbers = #tpu.dot_dimension_numbers<[1], [0], [0], [1], [0, 0, 1, 1], [], []>} : vector<16x16xbf16>, vector<16x16xbf16>, vector<16x16xf32> -> vector<16x16xf32>
    %116 = tpu.concatenate %52, %73, %94, %115 in 1 : vector<16x16xf32>, vector<16x16xf32>, vector<16x16xf32>, vector<16x16xf32> -> vector<16x64xf32>
    %117 = arith.truncf %116 : vector<16x64xf32> to vector<16x64xbf16>
    %c0_35 = arith.constant 0 : index
    %c0_36 = arith.constant 0 : index
    %118 = vector.load %arg4[%c0_35, %c0_36] : memref<64x64xbf16, #tpu.memory_space<vmem>>, vector<64x64xbf16>
    %cst_37 = arith.constant dense<0.000000e+00> : vector<16x64xf32>
    %119 = tpu.matmul %117, %118, %cst_37 {dimension_numbers = #tpu.dot_dimension_numbers<[1], [0], [0], [1], [0, 0, 1, 1], [], []>} : vector<16x64xbf16>, vector<64x64xbf16>, vector<16x64xf32> -> vector<16x64xf32>
    %c6 = arith.constant 6 : index
    %c0_38 = arith.constant 0 : index
    %120 = vector.load %arg8[%c6, %c0_38] : memref<24x256xf32, #tpu.memory_space<vmem>>, vector<1x64xf32>
    %121 = vector.broadcast %120 : vector<1x64xf32> to vector<16x64xf32>
    %122 = arith.addf %119, %121 : vector<16x64xf32>
    %123 = arith.addf %22, %122 : vector<16x64xf32>
    %c7 = arith.constant 7 : index
    %c0_39 = arith.constant 0 : index
    %124 = vector.load %arg8[%c7, %c0_39] : memref<24x256xf32, #tpu.memory_space<vmem>>, vector<1x64xf32>
    %c8 = arith.constant 8 : index
    %c0_40 = arith.constant 0 : index
    %125 = vector.load %arg8[%c8, %c0_40] : memref<24x256xf32, #tpu.memory_space<vmem>>, vector<1x64xf32>
    %cst_41 = arith.constant dense<0.000000e+00> : vector<16xf32>
    %126 = vector.multi_reduction <add>, %123, %cst_41 [1] : vector<16x64xf32> to vector<16xf32>
    %127 = vector.shape_cast %126 : vector<16xf32> to vector<16x1xf32>
    %cst_42 = arith.constant 6.400000e+01 : f32
    %128 = vector.broadcast %cst_42 : f32 to vector<16x1xf32>
    %129 = arith.divf %127, %128 : vector<16x1xf32>
    %130 = vector.broadcast %129 : vector<16x1xf32> to vector<16x64xf32>
    %131 = arith.subf %123, %130 : vector<16x64xf32>
    %132 = arith.mulf %131, %131 : vector<16x64xf32>
    %cst_43 = arith.constant dense<0.000000e+00> : vector<16xf32>
    %133 = vector.multi_reduction <add>, %132, %cst_43 [1] : vector<16x64xf32> to vector<16xf32>
    %134 = vector.shape_cast %133 : vector<16xf32> to vector<16x1xf32>
    %cst_44 = arith.constant 6.400000e+01 : f32
    %135 = vector.broadcast %cst_44 : f32 to vector<16x1xf32>
    %136 = arith.divf %134, %135 : vector<16x1xf32>
    %137 = vector.broadcast %129 : vector<16x1xf32> to vector<16x64xf32>
    %138 = arith.subf %123, %137 : vector<16x64xf32>
    %cst_45 = arith.constant 9.99999974E-6 : f32
    %139 = vector.broadcast %cst_45 : f32 to vector<16x1xf32>
    %140 = arith.addf %136, %139 : vector<16x1xf32>
    %141 = math.rsqrt %140 : vector<16x1xf32>
    %142 = vector.broadcast %141 : vector<16x1xf32> to vector<16x64xf32>
    %143 = arith.mulf %138, %142 : vector<16x64xf32>
    %144 = vector.broadcast %124 : vector<1x64xf32> to vector<16x64xf32>
    %145 = arith.mulf %143, %144 : vector<16x64xf32>
    %146 = vector.broadcast %125 : vector<1x64xf32> to vector<16x64xf32>
    %147 = arith.addf %145, %146 : vector<16x64xf32>
    %148 = arith.truncf %147 : vector<16x64xf32> to vector<16x64xbf16>
    %c0_46 = arith.constant 0 : index
    %c0_47 = arith.constant 0 : index
    %149 = vector.load %arg5[%c0_46, %c0_47] : memref<64x128xbf16, #tpu.memory_space<vmem>>, vector<64x128xbf16>
    %cst_48 = arith.constant dense<0.000000e+00> : vector<16x128xf32>
    %150 = tpu.matmul %148, %149, %cst_48 {dimension_numbers = #tpu.dot_dimension_numbers<[1], [0], [0], [1], [0, 0, 1, 1], [], []>} : vector<16x64xbf16>, vector<64x128xbf16>, vector<16x128xf32> -> vector<16x128xf32>
    %c9 = arith.constant 9 : index
    %c0_49 = arith.constant 0 : index
    %151 = vector.load %arg8[%c9, %c0_49] : memref<24x256xf32, #tpu.memory_space<vmem>>, vector<1x128xf32>
    %152 = vector.broadcast %151 : vector<1x128xf32> to vector<16x128xf32>
    %153 = arith.addf %150, %152 : vector<16x128xf32>
    %cst_50 = arith.constant 0.000000e+00 : f32
    %154 = vector.broadcast %cst_50 : f32 to vector<16x128xf32>
    %155 = arith.maximumf %153, %154 : vector<16x128xf32>
    %156 = arith.truncf %155 : vector<16x128xf32> to vector<16x128xbf16>
    %c0_51 = arith.constant 0 : index
    %c0_52 = arith.constant 0 : index
    %157 = vector.load %arg6[%c0_51, %c0_52] : memref<128x64xbf16, #tpu.memory_space<vmem>>, vector<128x64xbf16>
    %cst_53 = arith.constant dense<0.000000e+00> : vector<16x64xf32>
    %158 = tpu.matmul %156, %157, %cst_53 {dimension_numbers = #tpu.dot_dimension_numbers<[1], [0], [0], [1], [0, 0, 1, 1], [], []>} : vector<16x128xbf16>, vector<128x64xbf16>, vector<16x64xf32> -> vector<16x64xf32>
    %c10 = arith.constant 10 : index
    %c0_54 = arith.constant 0 : index
    %159 = vector.load %arg8[%c10, %c0_54] : memref<24x256xf32, #tpu.memory_space<vmem>>, vector<1x64xf32>
    %160 = vector.broadcast %159 : vector<1x64xf32> to vector<16x64xf32>
    %161 = arith.addf %158, %160 : vector<16x64xf32>
    %162 = arith.addf %147, %161 : vector<16x64xf32>
    %c11 = arith.constant 11 : index
    %c0_55 = arith.constant 0 : index
    %163 = vector.load %arg8[%c11, %c0_55] : memref<24x256xf32, #tpu.memory_space<vmem>>, vector<1x64xf32>
    %c12 = arith.constant 12 : index
    %c0_56 = arith.constant 0 : index
    %164 = vector.load %arg8[%c12, %c0_56] : memref<24x256xf32, #tpu.memory_space<vmem>>, vector<1x64xf32>
    %cst_57 = arith.constant dense<0.000000e+00> : vector<16xf32>
    %165 = vector.multi_reduction <add>, %162, %cst_57 [1] : vector<16x64xf32> to vector<16xf32>
    %166 = vector.shape_cast %165 : vector<16xf32> to vector<16x1xf32>
    %cst_58 = arith.constant 6.400000e+01 : f32
    %167 = vector.broadcast %cst_58 : f32 to vector<16x1xf32>
    %168 = arith.divf %166, %167 : vector<16x1xf32>
    %169 = vector.broadcast %168 : vector<16x1xf32> to vector<16x64xf32>
    %170 = arith.subf %162, %169 : vector<16x64xf32>
    %171 = arith.mulf %170, %170 : vector<16x64xf32>
    %cst_59 = arith.constant dense<0.000000e+00> : vector<16xf32>
    %172 = vector.multi_reduction <add>, %171, %cst_59 [1] : vector<16x64xf32> to vector<16xf32>
    %173 = vector.shape_cast %172 : vector<16xf32> to vector<16x1xf32>
    %cst_60 = arith.constant 6.400000e+01 : f32
    %174 = vector.broadcast %cst_60 : f32 to vector<16x1xf32>
    %175 = arith.divf %173, %174 : vector<16x1xf32>
    %176 = vector.broadcast %168 : vector<16x1xf32> to vector<16x64xf32>
    %177 = arith.subf %162, %176 : vector<16x64xf32>
    %cst_61 = arith.constant 9.99999974E-6 : f32
    %178 = vector.broadcast %cst_61 : f32 to vector<16x1xf32>
    %179 = arith.addf %175, %178 : vector<16x1xf32>
    %180 = math.rsqrt %179 : vector<16x1xf32>
    %181 = vector.broadcast %180 : vector<16x1xf32> to vector<16x64xf32>
    %182 = arith.mulf %177, %181 : vector<16x64xf32>
    %183 = vector.broadcast %163 : vector<1x64xf32> to vector<16x64xf32>
    %184 = arith.mulf %182, %183 : vector<16x64xf32>
    %185 = vector.broadcast %164 : vector<1x64xf32> to vector<16x64xf32>
    %186 = arith.addf %184, %185 : vector<16x64xf32>
    %c13 = arith.constant 13 : index
    %c0_62 = arith.constant 0 : index
    %187 = vector.load %arg8[%c13, %c0_62] : memref<24x256xf32, #tpu.memory_space<vmem>>, vector<1x64xf32>
    %c14 = arith.constant 14 : index
    %c0_63 = arith.constant 0 : index
    %188 = vector.load %arg8[%c14, %c0_63] : memref<24x256xf32, #tpu.memory_space<vmem>>, vector<1x64xf32>
    %c15 = arith.constant 15 : index
    %c0_64 = arith.constant 0 : index
    %189 = vector.load %arg8[%c15, %c0_64] : memref<24x256xf32, #tpu.memory_space<vmem>>, vector<1x64xf32>
    %c16 = arith.constant 16 : index
    %c0_65 = arith.constant 0 : index
    %190 = vector.load %arg8[%c16, %c0_65] : memref<24x256xf32, #tpu.memory_space<vmem>>, vector<1x64xf32>
    %191 = vector.broadcast %189 : vector<1x64xf32> to vector<16x64xf32>
    %192 = arith.subf %186, %191 : vector<16x64xf32>
    %cst_66 = arith.constant 9.99999974E-6 : f32
    %193 = vector.broadcast %cst_66 : f32 to vector<1x64xf32>
    %194 = arith.addf %190, %193 : vector<1x64xf32>
    %195 = math.rsqrt %194 : vector<1x64xf32>
    %196 = vector.broadcast %195 : vector<1x64xf32> to vector<16x64xf32>
    %197 = arith.mulf %192, %196 : vector<16x64xf32>
    %198 = vector.broadcast %187 : vector<1x64xf32> to vector<16x64xf32>
    %199 = arith.mulf %197, %198 : vector<16x64xf32>
    %200 = vector.broadcast %188 : vector<1x64xf32> to vector<16x64xf32>
    %201 = arith.addf %199, %200 : vector<16x64xf32>
    %202 = arith.truncf %201 : vector<16x64xf32> to vector<16x64xbf16>
    %c0_67 = arith.constant 0 : index
    %c0_68 = arith.constant 0 : index
    %203 = vector.load %arg7[%c0_67, %c0_68] : memref<64x128xbf16, #tpu.memory_space<vmem>>, vector<64x128xbf16>
    %cst_69 = arith.constant dense<0.000000e+00> : vector<16x128xf32>
    %204 = tpu.matmul %202, %203, %cst_69 {dimension_numbers = #tpu.dot_dimension_numbers<[1], [0], [0], [1], [0, 0, 1, 1], [], []>} : vector<16x64xbf16>, vector<64x128xbf16>, vector<16x128xf32> -> vector<16x128xf32>
    %c17 = arith.constant 17 : index
    %c0_70 = arith.constant 0 : index
    %205 = vector.load %arg8[%c17, %c0_70] : memref<24x256xf32, #tpu.memory_space<vmem>>, vector<1x128xf32>
    %206 = vector.broadcast %205 : vector<1x128xf32> to vector<16x128xf32>
    %207 = arith.addf %204, %206 : vector<16x128xf32>
    %cst_71 = arith.constant 0.000000e+00 : f32
    %208 = vector.broadcast %cst_71 : f32 to vector<16x128xf32>
    %209 = arith.maximumf %207, %208 : vector<16x128xf32>
    %c18 = arith.constant 18 : index
    %c0_72 = arith.constant 0 : index
    %210 = vector.load %arg8[%c18, %c0_72] : memref<24x256xf32, #tpu.memory_space<vmem>>, vector<1x128xf32>
    %211 = vector.broadcast %210 : vector<1x128xf32> to vector<16x128xf32>
    %212 = arith.mulf %209, %211 : vector<16x128xf32>
    %cst_73 = arith.constant dense<0.000000e+00> : vector<16xf32>
    %213 = vector.multi_reduction <add>, %212, %cst_73 [1] : vector<16x128xf32> to vector<16xf32>
    %214 = vector.shape_cast %213 : vector<16xf32> to vector<16x1xf32>
    %c20 = arith.constant 20 : index
    %c0_74 = arith.constant 0 : index
    %215 = vector.load %arg8[%c20, %c0_74] : memref<24x256xf32, #tpu.memory_space<vmem>>, vector<1x1xf32>
    %216 = vector.broadcast %215 : vector<1x1xf32> to vector<16x1xf32>
    %217 = arith.addf %214, %216 : vector<16x1xf32>
    %cst_75 = arith.constant dense<0xFF800000> : vector<1xf32>
    %218 = vector.multi_reduction <maximumf>, %217, %cst_75 [0] : vector<16x1xf32> to vector<1xf32>
    %219 = vector.shape_cast %218 : vector<1xf32> to vector<1x1xf32>
    %220 = vector.broadcast %219 : vector<1x1xf32> to vector<16x1xf32>
    %221 = arith.subf %217, %220 : vector<16x1xf32>
    %222 = math.exp %221 : vector<16x1xf32>
    %cst_76 = arith.constant dense<0.000000e+00> : vector<1xf32>
    %223 = vector.multi_reduction <add>, %222, %cst_76 [0] : vector<16x1xf32> to vector<1xf32>
    %224 = vector.shape_cast %223 : vector<1xf32> to vector<1x1xf32>
    %225 = tpu.reciprocal %224 {approx = true} : vector<1x1xf32> -> vector<1x1xf32>
    %226 = vector.broadcast %225 : vector<1x1xf32> to vector<16x1xf32>
    %227 = arith.mulf %222, %226 : vector<16x1xf32>
    %228 = vector.broadcast %227 : vector<16x1xf32> to vector<16x64xf32>
    %229 = arith.mulf %228, %201 : vector<16x64xf32>
    %cst_77 = arith.constant dense<0.000000e+00> : vector<64xf32>
    %230 = vector.multi_reduction <add>, %229, %cst_77 [0] : vector<16x64xf32> to vector<64xf32>
    %231 = vector.shape_cast %230 : vector<64xf32> to vector<1x64xf32>
    %c19 = arith.constant 19 : index
    %c0_78 = arith.constant 0 : index
    %232 = vector.load %arg8[%c19, %c0_78] : memref<24x256xf32, #tpu.memory_space<vmem>>, vector<1x64xf32>
    %233 = arith.mulf %231, %232 : vector<1x64xf32>
    %cst_79 = arith.constant dense<0.000000e+00> : vector<1xf32>
    %234 = vector.multi_reduction <add>, %233, %cst_79 [1] : vector<1x64xf32> to vector<1xf32>
    %235 = vector.shape_cast %234 : vector<1xf32> to vector<1x1xf32>
    %c21 = arith.constant 21 : index
    %c0_80 = arith.constant 0 : index
    %236 = vector.load %arg8[%c21, %c0_80] : memref<24x256xf32, #tpu.memory_space<vmem>>, vector<1x1xf32>
    %237 = arith.addf %235, %236 : vector<1x1xf32>
    %cst_81 = arith.constant 0.000000e+00 : f32
    %238 = vector.broadcast %cst_81 : f32 to vector<1x1xf32>
    %239 = arith.subf %238, %237 : vector<1x1xf32>
    %240 = math.exp %239 : vector<1x1xf32>
    %cst_82 = arith.constant 1.000000e+00 : f32
    %241 = vector.broadcast %cst_82 : f32 to vector<1x1xf32>
    %242 = arith.addf %241, %240 : vector<1x1xf32>
    %cst_83 = arith.constant 1.000000e+00 : f32
    %243 = vector.broadcast %cst_83 : f32 to vector<1x1xf32>
    %244 = arith.divf %243, %242 : vector<1x1xf32>
    %245 = vector.shape_cast %244 : vector<1x1xf32> to vector<1x1x1xf32>
    %246 = vector.broadcast %245 : vector<1x1x1xf32> to vector<1x8x128xf32>
    %c0_84 = arith.constant 0 : index
    %c0_85 = arith.constant 0 : index
    %c0_86 = arith.constant 0 : index
    %247 = vector.load %arg9[%c0_84, %c0_85, %c0_86] : memref<1x8x128xf32, #tpu.memory_space<vmem>>, vector<1x8x128xf32>
    tpu.vector_store %arg9[%c0_84, %c0_85, %c0_86], %246 {strides = array<i32>} : memref<1x8x128xf32, #tpu.memory_space<vmem>>, vector<1x8x128xf32>,
    return
  }
  func.func @transform_0(%arg0: i32) -> (i32, i32, i32) {
    %c0_i32 = arith.constant 0 : i32
    %c0_i32_0 = arith.constant 0 : i32
    %c0_i32_1 = arith.constant 0 : i32
    return %arg0, %c0_i32, %c0_i32_0 : i32, i32, i32
  }
  func.func @transform_1(%arg0: i32) -> (i32, i32) {
    %c0_i32 = arith.constant 0 : i32
    %c0_i32_0 = arith.constant 0 : i32
    %c0_i32_1 = arith.constant 0 : i32
    return %c0_i32, %c0_i32_0 : i32, i32
  }
  func.func @transform_2(%arg0: i32) -> (i32, i32) {
    %c0_i32 = arith.constant 0 : i32
    %c0_i32_0 = arith.constant 0 : i32
    %c0_i32_1 = arith.constant 0 : i32
    return %c0_i32, %c0_i32_0 : i32, i32
  }
  func.func @transform_3(%arg0: i32) -> (i32, i32) {
    %c0_i32 = arith.constant 0 : i32
    %c0_i32_0 = arith.constant 0 : i32
    %c0_i32_1 = arith.constant 0 : i32
    return %c0_i32, %c0_i32_0 : i32, i32
  }
  func.func @transform_4(%arg0: i32) -> (i32, i32) {
    %c0_i32 = arith.constant 0 : i32
    %c0_i32_0 = arith.constant 0 : i32
    %c0_i32_1 = arith.constant 0 : i32
    return %c0_i32, %c0_i32_0 : i32, i32
  }
  func.func @transform_5(%arg0: i32) -> (i32, i32) {
    %c0_i32 = arith.constant 0 : i32
    %c0_i32_0 = arith.constant 0 : i32
    %c0_i32_1 = arith.constant 0 : i32
    return %c0_i32, %c0_i32_0 : i32, i32
  }
  func.func @transform_6(%arg0: i32) -> (i32, i32) {
    %c0_i32 = arith.constant 0 : i32
    %c0_i32_0 = arith.constant 0 : i32
    %c0_i32_1 = arith.constant 0 : i32
    return %c0_i32, %c0_i32_0 : i32, i32
  }
  func.func @transform_7(%arg0: i32) -> (i32, i32) {
    %c0_i32 = arith.constant 0 : i32
    %c0_i32_0 = arith.constant 0 : i32
    %c0_i32_1 = arith.constant 0 : i32
    return %c0_i32, %c0_i32_0 : i32, i32
  }
  func.func @transform_8(%arg0: i32) -> (i32, i32, i32) {
    %c0_i32 = arith.constant 0 : i32
    %c0_i32_0 = arith.constant 0 : i32
    %c0_i32_1 = arith.constant 0 : i32
    return %arg0, %c0_i32, %c0_i32_0 : i32, i32, i32
  }
}

</mosaic_0001>

<bundles_post_ra>
// kernel: tpu_custom_call.1
= control target key start
LH: loop header
LB: loop body
LE: loop exit
PB: predicated region body
PF: predicated region fallthrough
CT: control target
= control target key end

     0   :  { %s2409_s0 = inlined_call_operand.vmem [shape: f32[2,16,64], index: 0, kind: input, shape index: {}]   ;;  %s2410_s1 = inlined_call_operand.hbm [shape: bf16[64,64], index: 1, kind: input, shape index: {}]   ;;  %s2411_s2 = inlined_call_operand.vmem [shape: bf16[64,192], index: 2, kind: input, shape index: {}]   ;;  %s2412_s3 = inlined_call_operand.hbm [shape: bf16[64,64], index: 3, kind: input, shape index: {}]   ;;  %s2413_s4 = inlined_call_operand.hbm [shape: bf16[64,128], index: 4, kind: input, shape index: {}]   ;;  %s2414_s5 = inlined_call_operand.vmem [shape: bf16[128,64], index: 5, kind: input, shape index: {}]   ;;  %s2415_s6 = inlined_call_operand.hbm [shape: bf16[64,128], index: 6, kind: input, shape index: {}]   ;;  %s2416_s7 = inlined_call_operand.hbm [shape: f32[24,256], index: 7, kind: input, shape index: {}]   ;;  %s2417_s8 = inlined_call_operand.hbm [shape: f32[2,8,128], index: 8, kind: output, shape index: {}]  }
   0x1   :  { %2419 = sst [smem:[#allocation18_spill]] %s2412_s3 }
   0x2   :  { %2420 = sst [smem:[#allocation19_spill]] %s2415_s6 }
   0x3   :  { %13 = vsyncpa [#allocation3], 0 }
   0x4   :  { %14 = vsyncpa [#allocation6], 0 }
   0x5   :  { %15 = vsyncpa [#allocation9], 0 }
   0x6   :  { %16 = vsyncpa [#allocation4], 0 }
   0x7   :  { %18 = vsyncpa [#allocation4 + $0x1], 0  ;;  %s2109_s27 = smov 0   ;;  %s2111_s28 = smov 0  }
   0x8   :  { %s2113_s29 = smov 0   ;;  %s2115_s30 = smov 0  }
   0x9 LB: > { %2421 = sst [smem:[#allocation16_spill]] %s2040_s29  ;;  %s2130_s9 = sadd.s32 4294967295, %s2044_s30   ;;  %s2044_s30 = sphi %s2115_s30, %s2433_s30   ;;  %s2040_s29 = sphi %s2113_s29, %s2430_s29   ;;  %s2036_s28 = sphi %s2111_s28, %s2432_s28   ;;  %s2032_s27 = sphi %s2109_s27, %s2431_s27  }
   0xa   : > { %s1447_s10 = sadd.s32 4294967294, %s2044_s30   ;;  %s2134_s11 = sadd.s32 1, %s2044_s30  }
   0xb   : > { %s204_s12 = sadd.s32 1, %s2040_s29  ;;  %s201_s13 = ssub.s32 %s2044_s30, %s2134_s11 }
   0xc   : > { %p214_p0 = scmp.ne.s32.totalorder %s2040_s29, %s2036_s28  ;;  %p202_p1 = scmp.eq.s32.totalorder %s201_s13, 0 }
   0xd   : > { %p215_p2 = scmp.eq.s32.totalorder %s2130_s9, 1  ;;  %p220_p3 = scmp.ne.s32.totalorder %s2036_s28, %s2032_s27 }
   0xe   : > { %p221_p4 = scmp.eq.s32.totalorder %s1447_s10, 1  ;;  %p1448_p7 = scmp.ge.s32.totalorder %s2044_s30, 1 }
   0xf   : > { %s2145_s14 = scalar_select %p202_p1, %s2040_s29, %s204_s12  }
  0x10   : > { %p2147_p5 = por %p215_p2, %p214_p0  ;;  %p2151_p6 = por %p221_p4, %p220_p3 }
  0x11   : > { %2422 = sst [smem:[#allocation17_spill]] %s2145_s14  ;;  %p228_p8 = scmp.lt.s32.totalorder %s2044_s30, 3 }
  0x12   : > { %p1685_p9 = scmp.eq.s32.totalorder %s2130_s9, 0  ;;  %s2426_s3 = sld [smem:[#allocation18_spill]] }
  0x13   : > { %p2158_p10 = pnand %p1448_p7, %p228_p8  ;;  %s2427_s6 = sld [smem:[#allocation19_spill]] }
  0x14   : > { %s2046_s25 = smov [#allocation5]   ;;  %s2047_s10 = smov 64  }
  0x15   : > { %p1665_p11 = pneg %p2158_p10  ;;  %s258_s26 = sshll.u32 %s2046_s25, 4  ;;  %s259_s26 = int_to_ptr.vmem [resolvable:$true] %s258_s26 }
  0x16   : > { %s2048_s12 = smov 4   ;;  %s2049_s13 = smov [#allocation8]  }
  0x17   : > { %p2172_p12 = pnand %p1685_p9, %p1665_p11  ;;  %s289_s18 = sshll.u32 %s2049_s13, 4  ;;  %s290_s18 = int_to_ptr.vmem [resolvable:$true] %s289_s18 }
  0x18   : > { %s256_s20 = sshll.u32 %s2426_s3, 4  ;;  %s239_s22 = sshll.u32 %s2410_s1, 4  ;;  %s257_s20 = int_to_ptr.hbm [resolvable:$true] %s256_s20  ;;  %s240_s22 = int_to_ptr.hbm [resolvable:$true] %s239_s22 }
  0x19   : > { %s287_s23 = sshll.u32 %s2427_s6, 4  ;;  %s270_s6 = sshll.u32 %s2413_s4, 4  ;;  %s288_s23 = int_to_ptr.hbm [resolvable:$true] %s287_s23  ;;  %s271_s6 = int_to_ptr.hbm [resolvable:$true] %s270_s6 }
  0x1a   : > { %1671 = dma.hbm_to_vmem [thread:$0]  (!%p2172_p12), %s257_s20, 512, %s259_s26, [#allocation6], %s2047_s10, %s2047_s10, %s2048_s12  }
  0x1b   : > { %1677 = dma.hbm_to_vmem [thread:$0]  (!%p2172_p12), %s288_s23, 512, %s290_s18, [#allocation9], %s2047_s10, %s2047_s10, %s2048_s12  }
  0x1c   : > { %s2050_s14 = smov [#allocation2]   ;;  %s2051_s20 = smov [#allocation7]  }
  0x1d   : > { %s241_s29 = sshll.u32 %s2050_s14, 4  ;;  %s272_s26 = sshll.u32 %s2051_s20, 4  ;;  %s242_s29 = int_to_ptr.vmem [resolvable:$true] %s241_s29  ;;  %s273_s26 = int_to_ptr.vmem [resolvable:$true] %s272_s26 }
  0x1e   : > { %1668 = dma.hbm_to_vmem [thread:$0]  (!%p2172_p12), %s240_s22, 512, %s242_s29, [#allocation3], %s2047_s10, %s2047_s10, %s2048_s12  }
  0x1f   : > { %s301_s21 = sshll.u32 %s2416_s7, 4  ;;  %s2052_s23 = smov [#allocation10]   ;;  %s302_s21 = int_to_ptr.hbm [resolvable:$true] %s301_s21 }
  0x20   : > { %1674 = dma.hbm_to_vmem [thread:$0]  (!%p2172_p12), %s271_s6, 512, %s273_s26, [#allocation6], %s2047_s10, %s2047_s10, %s2048_s12  }
  0x21   : > { %s303_s3 = sshll.u32 %s2052_s23, 4  ;;  %s2053_s18 = smov 256   ;;  %s304_s3 = int_to_ptr.vmem [resolvable:$true] %s303_s3 }
  0x22   : > { %s2054_s25 = smov 16   ;;  %327 = sbr.rel (%p2158_p10) target bundleno = 2860 (0xb2c), region = 52 }
  0x23   : > { %1680 = dma.hbm_to_vmem [thread:$0]  (!%p2172_p12), %s302_s21, 768, %s304_s3, [#allocation9], %s2053_s18, %s2053_s18, %s2054_s25  }
  0x27   : > { %2015 = dma.done.wait (%p1685_p9), [#allocation3], 512  }
  0x28   : > { %2017 = vsyncadd (%p1685_p9), [#allocation3], 4294966784 }
  0x29   : > { %2019 = dma.done.wait (%p1685_p9), [#allocation6], 1024  }
  0x2a   : > { %2021 = vsyncadd (%p1685_p9), [#allocation6], 4294966272 }
  0x2b   : > { %2023 = dma.done.wait (%p1685_p9), [#allocation9], 1280  }
  0x2c   : > { %2025 = vsyncadd (%p1685_p9), [#allocation9], 4294966016  ;;  %v1614_v0 = vld [vmem:[#allocation2 + $0x18] sm:$0xff]  ;;  %v1613_v1 = vld [vmem:[#allocation2 + $0x10] sm:$0xff]  ;;  %p382_p13 = scmp.lt.s32.totalorder %s2130_s9, 1  ;;  %vm447_vm3 = vcmask 523264  }
  0x2d   : > { %455 = vmatpush.bf16.msra.mxu2 %v1614_v0  ;;  %v393_v2 = vld [vmem:[#allocation10 + $0x3] ss:$0 sm:$0xff]  ;;  %v1507_v3 = vld [vmem:[%s2411_s2 + $0x30] sm:$0xf]  ;;  %v1622_v4 = vld [vmem:[%s2411_s2 + $0x34] sm:$0xf0] }
  0x2e   : > { %v396_v5 = vadd.f32 1e-05, %v393_v2  ;;  %v1508_v6 = vor.u32 %v1622_v4, %v1507_v3  ;;  %v1612_v7 = vld [vmem:[#allocation2 + $0x8] sm:$0xff]  ;;  %s383_s24 = scalar_select %p382_p13, %s2130_s9, 1  ;;  %v1621_v8 = vld [vmem:[%s2411_s2 + $0x34] sm:$0xf] }
  0x2f   : > { %v1509_v9 = vld [vmem:[%s2411_s2 + $0x38] sm:$0xf0]  ;;  %v1611_v10 = vld [vmem:[#allocation2] sm:$0xff]  ;;  %v1620_v34 = vld [vmem:[%s2411_s2 + $0x24] sm:$0xf0]  ;;  %s2055_s17 = smov 96  }
  0x30   : > { %1764 = vrsqrt.f32 %v396_v5  ;;  %528 = vmatpush.bf16.msra.mxu1 %v1508_v6  ;;  %s1610_s26 = sshll.u32 %s383_s24, 4  ;;  %v1512_v11 = vor.u32 %v1621_v8, %v1509_v9  ;;  %v392_v17 = vld [vmem:[#allocation10 + $0x2] ss:$0 sm:$0xff]  ;;  %vm403_vm0 = vweird.f32 %v396_v5  ;;  %v390_v23 = vld [vmem:[#allocation10] ss:$0 sm:$0xff]  ;;  %s2056_s24 = smov 32  }
  0x31   : > { %456 = vmatpush.bf16.msra.mxu2 %v1613_v1  ;;  %s386_s21 = scalar_lea.vmem %s2409_s0, %s1610_s26  ;;  %v391_v27 = vld [vmem:[#allocation10 + $0x1] ss:$0 sm:$0xff]  ;;  %v1619_v35 = vld [vmem:[%s2411_s2 + $0x24] sm:$0xf]  ;;  %v1501_v37 = vld [vmem:[%s2411_s2 + $0x28] sm:$0xf0] }
  0x32   : > { %v388_v15 = vld [vmem:[%s386_s21] sm:$0xff]  ;;  %v389_v16 = vld [vmem:[%s386_s21 + $0x8] sm:$0xff]  ;;  %v1504_v38 = vor.u32 %v1619_v35, %v1501_v37  ;;  %v1491_v39 = vld [vmem:[%s2411_s2 + $0x10] sm:$0xf]  ;;  %s2057_s10 = smov 64   ;;  %s2058_s12 = smov 16  }
  0x33   : > { %v394_v20 = vsub.f32 %v388_v15, %v392_v17  ;;  %v395_v21 = vsub.f32 %v389_v16, %v392_v17  ;;  %v1499_v33 = vld [vmem:[%s2411_s2 + $0x20] sm:$0xf]  ;;  %v1618_v40 = vld [vmem:[%s2411_s2 + $0x14] sm:$0xf0]  ;;  %v1617_v41 = vld [vmem:[%s2411_s2 + $0x14] sm:$0xf] }
  0x34   : > { %v1500_v36 = vor.u32 %v1620_v34, %v1499_v33  ;;  %v1492_v42 = vor.u32 %v1618_v40, %v1491_v39  ;;  %v1493_v43 = vld [vmem:[%s2411_s2 + $0x18] sm:$0xf0]  ;;  %v1483_v45 = vld [vmem:[%s2411_s2] sm:$0xf]  ;;  %v1616_v46 = vld [vmem:[%s2411_s2 + $0x4] sm:$0xf0] }
  0x35   : > { %457 = vmatpush.bf16.msra.mxu2 %v1612_v7  ;;  %v1496_v44 = vor.u32 %v1617_v41, %v1493_v43  ;;  %v1615_v47 = vld [vmem:[%s2411_s2 + $0x4] sm:$0xf]  ;;  %v1484_v48 = vor.u32 %v1616_v46, %v1483_v45  ;;  %v1485_v49 = vld [vmem:[%s2411_s2 + $0x8] sm:$0xf0]  ;;  %s2059_s22 = smov 112   ;;  %s2060_s20 = smov 48  }
  0x36   : > { %v1765_v12 = vpop.eup %1764  ;;  %529 = vmatpush.bf16.msra.mxu1 %v1500_v36  ;;  %v1488_v50 = vor.u32 %v1615_v47, %v1485_v49  ;;  %v422_v52 = vld [vmem:[#allocation10 + $0x4] ss:$0 sm:$0xff]  ;;  %v475_v58 = vld [vmem:[#allocation10 + $0x5] ss:$8 sm:$0x3]  ;;  %s2061_s26 = smov 80  }
  0x37   : > { %v398_v13 = vmul.f32 %v1765_v12, %v396_v5  ;;  %vm404_vm1 = vweird.f32 %v1765_v12  ;;  %v477_v59 = vperm.slane %v475_v58, 0  ;;  %v478_v2 = vperm.slane %v475_v58, 1  ;;  %s1607_s19 = sshll.u32 %s2130_s9, 3 }
  0x38   : > { %vm405_vm2 = vmor %vm403_vm0, %vm404_vm1  ;;  %vm557_vm4 = vcmask 130048   ;;  %vm854_vm5 = vcmask 261120   ;;  %vm857_vm6 = vcmask 392192   ;;  %s1333_s3 = scalar_lea.hbm %s2417_s8, %s1607_s19 }
  0x39   : > { %458 = vmatpush.bf16.msra.mxu2 %v1611_v10  ;;  %v399_v14 = vmul.f32 %v1765_v12, %v398_v13  ;;  %s1337_s6 = sshll.u32 %s1333_s3, 4  ;;  %s1338_s6 = int_to_ptr.hbm [resolvable:$true] %s1337_s6 }
  0x3a   : > { %530 = vmatpush.bf16.msra.mxu1 %v1492_v42  ;;  %s1984_s14 = sshra.s32 %s1338_s6, 4  ;;  %s1985_s14 = int_to_ptr.hbm [resolvable:$true] %s1984_s14 }
  0x3b   : > { %v400_v18 = vmul.f32 0.5, %v399_v14  ;;  %p1991_p3 = scmp.lt.s32.totalorder %s1985_s14, %s2417_s8 }
  0x3d   : > { %542 = vmatpush.bf16.msrb.mxu2 %v1512_v11  ;;  %v401_v19 = vsub.f32 1.5, %v400_v18 }
  0x3e   : > { %531 = vmatpush.bf16.msra.mxu1 %v1484_v48 }
  0x3f   : > { %v402_v22 = vmul.f32 %v1765_v12, %v401_v19 }
  0x41   : > { %v406_v24 = vsel %vm405_vm2, %v1765_v12, %v402_v22  ;;  %543 = vmatpush.bf16.msrb.mxu2 %v1504_v38 }
  0x42   : > { %v407_v25 = vmul.f32 %v406_v24, %v394_v20  ;;  %v408_v26 = vmul.f32 %v406_v24, %v395_v21 }
  0x44   : > { %v409_v28 = vmul.f32 %v407_v25, %v390_v23  ;;  %v410_v29 = vmul.f32 %v408_v26, %v390_v23 }
  0x45   : > { %544 = vmatpush.bf16.msrb.mxu2 %v1496_v44 }
  0x46   : > { %v411_v30 = vadd.f32 %v409_v28, %v391_v27  ;;  %v412_v31 = vadd.f32 %v410_v29, %v391_v27 }
  0x48   : > { %v413_v32 = vpack.c.bf16 %v412_v31, %v411_v30 }
  0x49   : > { %545 = vmatpush.bf16.msrb.mxu2 %v1488_v50 }
  0x4a   : > { %1480 = vmatmul.msk.bf16.vlgmr.msra.gmra.mxu2 %vm447_vm3, %v413_v32 }
  0xcd   : > { %v460_v51 = vpop.f32.mrf.mxu2 }
  0xce   : > { %v2263_v54 = vadd.f32 %v460_v51, %v422_v52 }
  0xd5   : > { %v462_v53 = vpop.f32.mrf.mxu2 }
  0xd6   : > { %v2265_v55 = vadd.f32 %v462_v53, %v422_v52 }
  0xd8   : > { %v465_v56 = vpack.c.bf16 %v2265_v55, %v2263_v54 }
  0xda   : > { %1513 = vmatmul.msk.bf16.vlgmr.msra.gmra.mxu1 %vm447_vm3, %v465_v56  ;;  %1514 = vmatmul.msk.bf16.vlgmr.msrb.gmra.mxu2 %vm447_vm3, %v465_v56 }
 0x157   : > { %v533_v57 = vpop.f32.mrf.mxu1 }
 0x158   : > { %v534_v61 = vadd.f32 %v533_v57, %v477_v59 }
 0x15d   : > { %v547_v0 = vpop.f32.mrf.mxu2 }
 0x15e   : > { %v548_v5 = vadd.f32 %v547_v0, %v478_v2 }
 0x15f   : > { %v535_v60 = vpop.f32.mrf.mxu1 }
 0x160   : > { %v536_v62 = vadd.f32 %v535_v60, %v477_v59 }
 0x162   : > { %v552_v63 = vpack.c.bf16 %v536_v62, %v534_v61 }
 0x164   : > { %690 = vrot.lane.b32.xlu2 %v552_v63, %s2055_s17  ;;  %692 = vrot.lane.b32.xlu1 %v552_v63, %s2056_s24 }
 0x165   : > { %555 = vrot.lane.b32.xlu0 %v552_v63, %s2057_s10  ;;  %v549_v1 = vpop.f32.mrf.mxu2  ;;  %s1990_s10 = scalar_lea.hbm %s2417_s8, 16 }
 0x166   : > { %v550_v3 = vadd.f32 %v549_v1, %v478_v2 }
 0x168   : > { %v2278_v9 = vpack.c.bf16 %v550_v3, %v548_v5 }
 0x16c   : > { %761 = vrot.lane.b32.xlu2 %v552_v63, %s2058_s12  ;;  %620 = vrot.lane.b32.xlu1 %v552_v63, %s2059_s22 }
 0x16d   : > { %622 = vrot.lane.b32.xlu0 %v552_v63, %s2060_s20 }
 0x175   : > { %759 = vrot.lane.b32.xlu0 %v552_v63, %s2061_s26 }
 0x1be   : > { %v691_v4 = vpop.permute.xlu2 %690 }
 0x1c6   : > { %v762_v11 = vpop.permute.xlu2 %761 }
 0x1c7   : > { %v767_v14 = vsel %vm557_vm4, %v762_v11, 0 }
 0x1d6   : > { %v693_v6 = vpop.permute.xlu1 %692 }
 0x1d7   : > { %v698_v7 = vsel %vm557_vm4, %v693_v6, 0  ;;  %v556_v8 = vpop.permute.xlu0 %555 }
 0x1d8   : > { %v562_v10 = vsel %vm557_vm4, %v556_v8, 0  ;;  %707 = vmatpush.bf16.xpose.msra.mxu2 %v698_v7 }
 0x1d9   : > { %571 = vmatpush.bf16.xpose.msra.mxu3 %v562_v10 }
 0x1de   : > { %v621_v15 = vpop.permute.xlu1 %620 }
 0x1df   : > { %v623_v12 = vpop.permute.xlu0 %622  ;;  %1519 = vmatmul.msk.bf16.vlgmr.msra.gmra.mxu2 %vm557_vm4, %v691_v4 }
 0x1e0   : > { %1515 = vmatmul.msk.bf16.vlgmr.msra.gmra.mxu3 %vm557_vm4, %v552_v63  ;;  %v628_v13 = vsel %vm557_vm4, %v623_v12, 0 }
 0x1e1   : > { %613 = vmatpush.bf16.msrb.mxu3 %v2278_v9  ;;  %637 = vmatpush.bf16.xpose.msra.mxu0 %v628_v13 }
 0x1e7   : > { %v760_v16 = vpop.permute.xlu0 %759 }
 0x1e8   : > { %1517 = vmatmul.msk.bf16.vlgmr.msra.gmra.mxu0 %vm557_vm4, %v621_v15 }
 0x1e9   : > { %776 = vmatpush.bf16.xpose.msrb.mxu0 %v767_v14 }
 0x1f8   : > { %1521 = vmatmul.msk.bf16.vlgmr.msrb.gmra.mxu0 %vm557_vm4, %v760_v16 }
 0x262   : > { %v709_v22 = vpop.f32.mrf.mxu2 }
 0x263   : > { %v573_v17 = vpop.f32.mrf.mxu3  ;;  %v714_v24 = vmul.f32 0.25, %v709_v22 }
 0x264   : > { %v578_v18 = vmul.f32 0.25, %v573_v17 }
 0x265   : > { %v639_v19 = vpop.f32.mrf.mxu0  ;;  %v716_v28 = vsel %vm557_vm4, %v714_v24, -inf }
 0x266   : > { %v644_v20 = vmul.f32 0.25, %v639_v19  ;;  %v580_v21 = vsel %vm557_vm4, %v578_v18, -inf }
 0x267   : > { %581 = vmax.xlane.f32.xlu1 %v580_v21 }
 0x268   : > { %v646_v23 = vsel %vm557_vm4, %v644_v20, -inf }
 0x269   : > { %647 = vmax.xlane.f32.xlu0 %v646_v23 }
 0x26a   : > { %v711_v34 = vpop.f32.mrf.mxu2 }
 0x26b   : > { %v575_v25 = vpop.f32.mrf.mxu3  ;;  %v715_v36 = vmul.f32 0.25, %v711_v34 }
 0x26c   : > { %v579_v26 = vmul.f32 0.25, %v575_v25 }
 0x26d   : > { %v641_v27 = vpop.f32.mrf.mxu0  ;;  %v719_v39 = vsel %vm557_vm4, %v715_v36, -inf }
 0x26e   : > { %v583_v29 = vsel %vm557_vm4, %v579_v26, -inf  ;;  %v645_v30 = vmul.f32 0.25, %v641_v27 }
 0x26f   : > { %717 = vmax.xlane.f32.xlu1 %v716_v28  ;;  %584 = vmax.xlane.f32.xlu2 %v583_v29 }
 0x270   : > { %v649_v33 = vsel %vm557_vm4, %v645_v30, -inf }
 0x275   : > { %v778_v31 = vpop.f32.mrf.mxu0 }
 0x276   : > { %v783_v32 = vmul.f32 0.25, %v778_v31 }
 0x277   : > { %650 = vmax.xlane.f32.xlu2 %v649_v33 }
 0x278   : > { %v785_v35 = vsel %vm557_vm4, %v783_v32, -inf }
 0x279   : > { %786 = vmax.xlane.f32.xlu0 %v785_v35 }
 0x27d   : > { %v780_v37 = vpop.f32.mrf.mxu0 }
 0x27e   : > { %v784_v38 = vmul.f32 0.25, %v780_v37 }
 0x27f   : > { %720 = vmax.xlane.f32.xlu2 %v719_v39 }
 0x280   : > { %v788_v40 = vsel %vm557_vm4, %v784_v38, -inf }
 0x281   : > { %789 = vmax.xlane.f32.xlu1 %v788_v40 }
 0x28d   : > { %670 = vrot.lane.b32.xlu0 %v2278_v9, %s2059_s22 }
 0x2da   : > { %v582_v41 = vpop.xlane.xlu1 %581 }
 0x2db   : > { %v586_v42 = vsub.f32 %v578_v18, %v582_v41 }
 0x2dc   : > { %v648_v43 = vpop.xlane.xlu0 %647 }
 0x2dd   : > { %v588_v44 = vmul.f32 1.442695, %v586_v42  ;;  %v652_v45 = vsub.f32 %v644_v20, %v648_v43 }
 0x2df   : > { %1766 = vpow2.f32 %v588_v44  ;;  %v654_v46 = vmul.f32 1.442695, %v652_v45 }
 0x2e1   : > { %1768 = vpow2.f32 %v654_v46 }
 0x2e2   : > { %v718_v47 = vpop.xlane.xlu1 %717  ;;  %v585_v48 = vpop.xlane.xlu2 %584 }
 0x2e3   : > { %v722_v49 = vsub.f32 %v714_v24, %v718_v47  ;;  %v587_v50 = vsub.f32 %v579_v26, %v585_v48 }
 0x2e5   : > { %v1767_v51 = vpop.eup %1766  ;;  %v724_v52 = vmul.f32 1.442695, %v722_v49  ;;  %v590_v53 = vmul.f32 1.442695, %v587_v50 }
 0x2e6   : > { %v592_v56 = vsel %vm557_vm4, %v1767_v51, 0.0 }
 0x2e7   : > { %v1769_v57 = vpop.eup %1768  ;;  %1770 = vpow2.f32 %v724_v52  ;;  %593 = vadd.xlane.f32.xlu2 %v592_v56 }
 0x2e8   : > { %1772 = vpow2.f32 %v590_v53  ;;  %v658_v58 = vsel %vm557_vm4, %v1769_v57, 0.0 }
 0x2e9   : > { %659 = vadd.xlane.f32.xlu1 %v658_v58 }
 0x2ea   : > { %v651_v59 = vpop.xlane.xlu2 %650 }
 0x2eb   : > { %v653_v60 = vsub.f32 %v645_v30, %v651_v59 }
 0x2ec   : > { %v787_v61 = vpop.xlane.xlu0 %786 }
 0x2ed   : > { %v2300_v62 = vpop.eup %1770  ;;  %v656_v63 = vmul.f32 1.442695, %v653_v60  ;;  %v791_v0 = vsub.f32 %v783_v32, %v787_v61 }
 0x2ee   : > { %v1773_v1 = vpop.eup %1772  ;;  %v728_v4 = vsel %vm557_vm4, %v2300_v62, 0.0 }
 0x2ef   : > { %1774 = vpow2.f32 %v656_v63  ;;  %v793_v2 = vmul.f32 1.442695, %v791_v0  ;;  %v595_v3 = vsel %vm557_vm4, %v1773_v1, 0.0  ;;  %v1626_v63 = vld [vmem:[#allocation5 + $0x18] sm:$0xff]  ;;  %v1625_v0 = vld [vmem:[#allocation5 + $0x10] sm:$0xff] }
 0x2f0   : > { %596 = vadd.xlane.f32.xlu0 %v595_v3  ;;  %901 = vmatpush.bf16.msrb.mxu2 %v1626_v63 }
 0x2f1   : > { %1776 = vpow2.f32 %v793_v2  ;;  %729 = vadd.xlane.f32.xlu1 %v728_v4  ;;  %v1623_v2 = vld [vmem:[#allocation5] sm:$0xff] }
 0x2f2   : > { %v721_v5 = vpop.xlane.xlu2 %720 }
 0x2f3   : > { %v723_v6 = vsub.f32 %v715_v36, %v721_v5 }
 0x2f4   : > { %v790_v7 = vpop.xlane.xlu1 %789  ;;  %902 = vmatpush.bf16.msrb.mxu2 %v1625_v0 }
 0x2f5   : > { %v1775_v8 = vpop.eup %1774  ;;  %v726_v10 = vmul.f32 1.442695, %v723_v6  ;;  %v792_v11 = vsub.f32 %v784_v38, %v790_v7 }
 0x2f6   : > { %v661_v12 = vsel %vm557_vm4, %v1775_v8, 0.0 }
 0x2f7   : > { %v1777_v13 = vpop.eup %1776  ;;  %1778 = vpow2.f32 %v726_v10  ;;  %662 = vadd.xlane.f32.xlu2 %v661_v12  ;;  %v795_v15 = vmul.f32 1.442695, %v792_v11 }
 0x2f8   : > { %v797_v14 = vsel %vm557_vm4, %v1777_v13, 0.0 }
 0x2f9   : > { %798 = vadd.xlane.f32.xlu1 %v797_v14  ;;  %1780 = vpow2.f32 %v795_v15 }
 0x2fd   : > { %v1779_v16 = vpop.eup %1778 }
 0x2fe   : > { %v731_v17 = vsel %vm557_vm4, %v1779_v16, 0.0 }
 0x2ff   : > { %732 = vadd.xlane.f32.xlu2 %v731_v17  ;;  %v671_v18 = vpop.permute.xlu0 %670  ;;  %v1781_v19 = vpop.eup %1780 }
 0x300   : > { %683 = vmatpush.bf16.msrb.mxu1 %v671_v18  ;;  %v800_v20 = vsel %vm557_vm4, %v1781_v19, 0.0 }
 0x304   : > { %808 = vrot.lane.b32.xlu0 %v2278_v9, %s2061_s26  ;;  %s379_s26 = sand.u32 1, %s2036_s28  }
 0x305   : > { %s1461_s13 = sshll.u32 %s379_s26, 3  ;;  %s1323_s29 = scalar_lea.sflag [#allocation4], %s379_s26 }
 0x306   : > { %s381_s18 = scalar_lea.vmem [#allocation11], %s1461_s13 }
 0x307   : > { %801 = vadd.xlane.f32.xlu2 %v800_v20  ;;  %v869_v20 = vld [vmem:[#allocation10 + $0x6] ss:$0 sm:$0xff]  ;;  %s1335_s25 = sshll.u32 %s381_s18, 4  ;;  %s1336_s25 = int_to_ptr.vmem [resolvable:$true] %s1335_s25 }
 0x312   : > { %739 = vrot.lane.b32.xlu1 %v2278_v9, %s2055_s17  ;;  %s1986_s17 = scalar_lea.hbm %s1985_s14, 8 }
 0x313   : > { %p1987_p0 = scmp.ne.s32.totalorder %s1985_s14, %s1986_s17  ;;  %p1992_p4 = scmp.lt.s32.totalorder %s1990_s10, %s1986_s17 }
 0x315   : > { %p1988_p1 = pnand %p1987_p0, %p2147_p5  ;;  %p1993_p7 = por %p1992_p4, %p1991_p3 }
 0x317   : > { %p1989_p2 = pneg %p1988_p1 }
 0x319   : > { %p1994_p8 = pnand %p1993_p7, %p1989_p2 }
 0x35a   : > { %v594_v21 = vpop.xlane.xlu2 %593 }
 0x35b   : > { %1782 = vrcp.f32 %v594_v21 }
 0x35c   : > { %v660_v22 = vpop.xlane.xlu1 %659 }
 0x361   : > { %v1783_v24 = vpop.eup %1782 }
 0x362   : > { %v600_v27 = vmul.f32 %v1783_v24, %v1767_v51 }
 0x363   : > { %v597_v23 = vpop.xlane.xlu0 %596 }
 0x364   : > { %1784 = vrcp.f32 %v597_v23  ;;  %v730_v29 = vpop.xlane.xlu1 %729 }
 0x365   : > { %1786 = vrcp.f32 %v660_v22 }
 0x36a   : > { %v1785_v25 = vpop.eup %1784  ;;  %v663_v26 = vpop.xlane.xlu2 %662 }
 0x36b   : > { %v601_v28 = vmul.f32 %v1785_v25, %v1773_v1  ;;  %1788 = vrcp.f32 %v663_v26  ;;  %v1787_v31 = vpop.eup %1786  ;;  %v1624_v1 = vld [vmem:[#allocation5 + $0x8] sm:$0xff] }
 0x36c   : > { %v666_v33 = vmul.f32 %v1787_v31, %v1769_v57  ;;  %v799_v36 = vpop.xlane.xlu1 %798  ;;  %903 = vmatpush.bf16.msrb.mxu2 %v1624_v1 }
 0x36d   : > { %v602_v30 = vpack.c.bf16 %v601_v28, %v600_v27  ;;  %1790 = vrcp.f32 %v799_v36 }
 0x36f   : > { %1516 = vmatmul.msk.bf16.vlgmr.msrb.gmra.mxu3 %vm557_vm4, %v602_v30 }
 0x370   : > { %904 = vmatpush.bf16.msrb.mxu2 %v1623_v2 }
 0x371   : > { %v1789_v32 = vpop.eup %1788 }
 0x372   : > { %v667_v9 = vmul.f32 %v1789_v32, %v1775_v8  ;;  %v733_v34 = vpop.xlane.xlu2 %732 }
 0x373   : > { %1792 = vrcp.f32 %v733_v34  ;;  %v1791_v39 = vpop.eup %1790 }
 0x374   : > { %v668_v35 = vpack.c.bf16 %v667_v9, %v666_v33  ;;  %1794 = vrcp.f32 %v730_v29  ;;  %v805_v43 = vmul.f32 %v1791_v39, %v1777_v13  ;;  %v2062_v29 = vmov 64.0  }
 0x376   : > { %v809_v37 = vpop.permute.xlu0 %808  ;;  %1518 = vmatmul.msk.bf16.vlgmr.msrb.gmra.mxu1 %vm557_vm4, %v668_v35 }
 0x377   : > { %821 = vmatpush.bf16.msra.mxu1 %v809_v37 }
 0x379   : > { %v1793_v40 = vpop.eup %1792 }
 0x37a   : > { %v802_v38 = vpop.xlane.xlu2 %801  ;;  %v1795_v41 = vpop.eup %1794  ;;  %v737_v44 = vmul.f32 %v1793_v40, %v1779_v16 }
 0x37b   : > { %1796 = vrcp.f32 %v802_v38  ;;  %v736_v46 = vmul.f32 %v1795_v41, %v2300_v62 }
 0x37c   : > { %1798 = vrcp.f32 %v2062_v29 }
 0x37d   : > { %v738_v49 = vpack.c.bf16 %v737_v44, %v736_v46  ;;  %v1629_v44 = vld [vmem:[#allocation7 + $0x10] sm:$0xff] }
 0x381   : > { %v1797_v42 = vpop.eup %1796 }
 0x382   : > { %v806_v45 = vmul.f32 %v1797_v42, %v1781_v19  ;;  %v1799_v30 = vpop.eup %1798 }
 0x383   : > { %v922_v31 = vmul.f32 64.0, %v1799_v30  ;;  %vm926_vm7 = vweird.f32 %v1799_v30 }
 0x384   : > { %v807_v47 = vpack.c.bf16 %v806_v45, %v805_v43  ;;  %v740_v48 = vpop.permute.xlu1 %739  ;;  %v1630_v43 = vld [vmem:[#allocation7 + $0x18] sm:$0xff]  ;;  %v1628_v45 = vld [vmem:[#allocation7 + $0x8] sm:$0xff] }
 0x385   : > { %752 = vmatpush.bf16.msra.mxu3 %v740_v48  ;;  %v923_v32 = vsub.f32 1.0, %v922_v31  ;;  %v1040_v31 = vld [vmem:[#allocation10 + $0x12] ss:$0 sm:$0xff] }
 0x386   : > { %1522 = vmatmul.msk.bf16.vlgmr.msra.gmra.mxu1 %vm557_vm4, %v807_v47 }
 0x387   : > { %v924_v33 = vmul.f32 %v1799_v30, %v923_v32 }
 0x388   : > { %1520 = vmatmul.msk.bf16.vlgmr.msra.gmra.mxu3 %vm557_vm4, %v738_v49  ;;  %v1627_v49 = vld [vmem:[#allocation7] sm:$0xff] }
 0x389   : > { %v925_v9 = vadd.f32 %v1799_v30, %v924_v33  ;;  %1011 = vmatpush.bf16.msrb.mxu3 %v1630_v43 }
 0x38b   : > { %v2328_v34 = vsel %vm926_vm7, %v1799_v30, %v925_v9 }
 0x38d   : > { %1012 = vmatpush.bf16.msrb.mxu3 %v1629_v44 }
 0x391   : > { %1013 = vmatpush.bf16.msrb.mxu3 %v1628_v45 }
 0x395   : > { %1014 = vmatpush.bf16.msrb.mxu3 %v1627_v49 }
 0x3f2   : > { %v615_v51 = vpop.f32.mrf.mxu3 }
 0x3f3   : > { %v685_v50 = vpop.f32.mrf.mxu1 }
 0x3fa   : > { %v617_v56 = vpop.f32.mrf.mxu3 }
 0x3fb   : > { %v687_v52 = vpop.f32.mrf.mxu1 }
 0x3fc   : > { %v1746_v53 = vpack.i.bf16 %v687_v52, %v685_v50  ;;  %v1638_v50 = vld [vmem:[%s2414_s5 + $0x38] sm:$0xff] }
 0x3fd   : > { %1089 = vmatpush.bf16.msra.mxu0 %v1638_v50  ;;  %v1642_v50 = vld [vmem:[#allocation8 + $0x18] sm:$0xff] }
 0x3fe   : > { %1747 = vrot.lane.b32.xlu2 %v1746_v53, %s2058_s12  ;;  %v1637_v53 = vld [vmem:[%s2414_s5 + $0x30] sm:$0xff]  ;;  %1219 = vmatpush.bf16.msrb.mxu1 %v1642_v50 }
 0x401   : > { %1090 = vmatpush.bf16.msra.mxu0 %v1637_v53 }
 0x403   : > { %v823_v58 = vpop.f32.mrf.mxu1 }
 0x40b   : > { %v754_v57 = vpop.f32.mrf.mxu3  ;;  %v825_v61 = vpop.f32.mrf.mxu1 }
 0x40c   : > { %v1756_v62 = vpack.i.bf16 %v825_v61, %v823_v58 }
 0x413   : > { %v756_v59 = vpop.f32.mrf.mxu3 }
 0x414   : > { %v1751_v60 = vpack.i.bf16 %v756_v59, %v754_v57  ;;  %v1636_v59 = vld [vmem:[%s2414_s5 + $0x28] sm:$0xff] }
 0x415   : > { %1091 = vmatpush.bf16.msra.mxu0 %v1636_v59 }
 0x416   : > { %1752 = vrot.lane.b32.xlu0 %v1751_v60, %s2056_s24 }
 0x41e   : > { %1757 = vrot.lane.b32.xlu0 %v1756_v62, %s2060_s20  ;;  %v1635_v62 = vld [vmem:[%s2414_s5 + $0x20] sm:$0xff] }
 0x41f   : > { %1092 = vmatpush.bf16.msra.mxu0 %v1635_v62 }
 0x458   : > { %v1748_v4 = vpop.permute.xlu2 %1747 }
 0x459   : > { %v1750_v5 = vunpack.i.h.bf16 %v1748_v4  ;;  %v1749_v6 = vunpack.i.l.bf16 %v1748_v4 }
 0x45b   : > { %v852_v11 = vsel %vm557_vm4, %v615_v51, %v1749_v6  ;;  %v853_v12 = vsel %vm557_vm4, %v617_v56, %v1750_v5 }
 0x488   : > { %v1753_v3 = vpop.permute.xlu0 %1752 }
 0x489   : > { %v1755_v7 = vunpack.i.h.bf16 %v1753_v3  ;;  %v1754_v8 = vunpack.i.l.bf16 %v1753_v3 }
 0x48b   : > { %v856_v15 = vsel %vm854_vm5, %v853_v12, %v1755_v7  ;;  %v855_v16 = vsel %vm854_vm5, %v852_v11, %v1754_v8  ;;  %v913_v8 = vld [vmem:[#allocation10 + $0x7] ss:$0 sm:$0xff] }
 0x490   : > { %v1758_v10 = vpop.permute.xlu0 %1757 }
 0x491   : > { %v1760_v13 = vunpack.i.h.bf16 %v1758_v10  ;;  %v1759_v14 = vunpack.i.l.bf16 %v1758_v10 }
 0x493   : > { %v858_v17 = vsel %vm857_vm6, %v855_v16, %v1759_v14  ;;  %v859_v18 = vsel %vm857_vm6, %v856_v15, %v1760_v13  ;;  %v914_v14 = vld [vmem:[#allocation10 + $0x10] ss:$0 sm:$0xff] }
 0x494   : > { %v860_v19 = vpack.c.bf16 %v859_v18, %v858_v17 }
 0x496   : > { %1539 = vmatmul.msk.bf16.vlgmr.msrb.gmra.mxu2 %vm447_vm3, %v860_v19  ;;  %v1634_v19 = vld [vmem:[%s2414_s5 + $0x18] sm:$0xff] }
 0x497   : > { %1093 = vmatpush.bf16.msra.mxu0 %v1634_v19 }
 0x519   : > { %v906_v21 = vpop.f32.mrf.mxu2 }
 0x51a   : > { %v907_v22 = vadd.f32 %v906_v21, %v869_v20  ;;  %v1632_v21 = vld [vmem:[%s2414_s5 + $0x8] sm:$0xff] }
 0x51c   : > { %v911_v23 = vadd.f32 %v907_v22, %v2263_v54  ;;  %v1631_v22 = vld [vmem:[%s2414_s5] sm:$0xff] }
 0x51e   : > { %v915_v24 = vsel %vm447_vm3, %v911_v23, 0.0 }
 0x51f   : > { %916 = vadd.xlane.f32.xlu1 %v915_v24  ;;  %v979_v24 = vld [vmem:[#allocation10 + $0x11] ss:$0 sm:$0xff] }
 0x521   : > { %v908_v25 = vpop.f32.mrf.mxu2 }
 0x522   : > { %v909_v26 = vadd.f32 %v908_v25, %v869_v20  ;;  %v1633_v20 = vld [vmem:[%s2414_s5 + $0x10] sm:$0xff] }
 0x523   : > { %1094 = vmatpush.bf16.msra.mxu0 %v1633_v20  ;;  %v1157_v20 = vld [vmem:[#allocation10 + $0x17] ss:$0 sm:$0xff] }
 0x524   : > { %v912_v27 = vadd.f32 %v909_v26, %v2265_v55 }
 0x526   : > { %v918_v28 = vsel %vm447_vm3, %v912_v27, 0.0 }
 0x527   : > { %919 = vadd.xlane.f32.xlu0 %v918_v28  ;;  %1095 = vmatpush.bf16.msra.mxu0 %v1632_v21 }
 0x52b   : > { %1096 = vmatpush.bf16.msra.mxu0 %v1631_v22 }
 0x592   : > { %v917_v54 = vpop.xlane.xlu1 %916 }
 0x593   : > { %v928_v35 = vmul.f32 %v2328_v34, %v917_v54 }
 0x595   : > { %v930_v36 = vsub.f32 %v911_v23, %v928_v35 }
 0x597   : > { %v932_v37 = vmul.f32 %v930_v36, %v930_v36 }
 0x599   : > { %v934_v55 = vsel %vm447_vm3, %v932_v37, 0.0 }
 0x59a   : > { %v920_v38 = vpop.xlane.xlu0 %919  ;;  %935 = vadd.xlane.f32.xlu2 %v934_v55 }
 0x59b   : > { %v929_v39 = vmul.f32 %v2328_v34, %v920_v38 }
 0x59d   : > { %v931_v40 = vsub.f32 %v912_v27, %v929_v39 }
 0x59f   : > { %v933_v41 = vmul.f32 %v931_v40, %v931_v40 }
 0x5a1   : > { %v937_v42 = vsel %vm447_vm3, %v933_v41, 0.0 }
 0x5a2   : > { %938 = vadd.xlane.f32.xlu1 %v937_v42 }
 0x60d   : > { %v936_v46 = vpop.xlane.xlu2 %935 }
 0x60e   : > { %v940_v47 = vmul.f32 %v936_v46, %v2328_v34 }
 0x610   : > { %v942_v48 = vadd.f32 1e-05, %v940_v47 }
 0x612   : > { %1800 = vrsqrt.f32 %v942_v48  ;;  %vm950_vm9 = vweird.f32 %v942_v48 }
 0x615   : > { %v939_v51 = vpop.xlane.xlu1 %938 }
 0x616   : > { %v941_v52 = vmul.f32 %v939_v51, %v2328_v34 }
 0x618   : > { %v1801_v56 = vpop.eup %1800  ;;  %v943_v57 = vadd.f32 1e-05, %v941_v52 }
 0x619   : > { %v945_v58 = vmul.f32 %v1801_v56, %v942_v48  ;;  %vm951_vm8 = vweird.f32 %v1801_v56  ;;  %v1158_v48 = vld [vmem:[#allocation10 + $0x20] ss:$0 sm:$0xff] }
 0x61a   : > { %1802 = vrsqrt.f32 %v943_v57  ;;  %vm952_vm10 = vmor %vm950_vm9, %vm951_vm8  ;;  %vm960_vm12 = vweird.f32 %v943_v57  ;;  %v1161_v49 = vadd.f32 1e-05, %v1158_v48  ;;  %vm1241_vm8 = vcmask 7168  }
 0x61b   : > { %v946_v60 = vmul.f32 %v1801_v56, %v945_v58 }
 0x61c   : > { %1804 = vrsqrt.f32 %v1161_v49  ;;  %vm1168_vm1 = vweird.f32 %v1161_v49 }
 0x61d   : > { %v947_v61 = vmul.f32 0.5, %v946_v60 }
 0x61f   : > { %v948_v63 = vsub.f32 1.5, %v947_v61  ;;  %v1639_v61 = vld [vmem:[#allocation8] sm:$0xff] }
 0x620   : > { %v1803_v0 = vpop.eup %1802 }
 0x621   : > { %v949_v1 = vmul.f32 %v1801_v56, %v948_v63  ;;  %v955_v2 = vmul.f32 %v1803_v0, %v943_v57  ;;  %vm961_vm11 = vweird.f32 %v1803_v0  ;;  %v1640_v57 = vld [vmem:[#allocation8 + $0x8] sm:$0xff] }
 0x622   : > { %vm962_vm13 = vmor %vm960_vm12, %vm961_vm11  ;;  %v1805_v59 = vpop.eup %1804 }
 0x623   : > { %v956_v3 = vmul.f32 %v1803_v0, %v955_v2  ;;  %v953_v4 = vsel %vm952_vm10, %v1801_v56, %v949_v1  ;;  %v1641_v56 = vld [vmem:[#allocation8 + $0x10] sm:$0xff]  ;;  %vm1169_vm2 = vweird.f32 %v1805_v59 }
 0x624   : > { %v964_v7 = vmul.f32 %v953_v4, %v930_v36  ;;  %1220 = vmatpush.bf16.msrb.mxu1 %v1641_v56  ;;  %vm1170_vm5 = vmor %vm1168_vm1, %vm1169_vm2 }
 0x625   : > { %v957_v5 = vmul.f32 0.5, %v956_v3 }
 0x626   : > { %v966_v12 = vmul.f32 %v964_v7, %v913_v8 }
 0x627   : > { %v958_v6 = vsub.f32 1.5, %v957_v5 }
 0x628   : > { %v968_v16 = vadd.f32 %v966_v12, %v914_v14  ;;  %1221 = vmatpush.bf16.msrb.mxu1 %v1640_v57  ;;  %v2063_v57 = vmov 0  }
 0x629   : > { %v959_v10 = vmul.f32 %v1803_v0, %v958_v6  ;;  %1762 = vset.pattern.permute.xlu2 %v2063_v57  ;;  %1761 = vset.pattern.permute.xlu0 %v2063_v57 }
 0x62a   : > { %1763 = vset.pattern.permute.xlu1 %v2063_v57 }
 0x62b   : > { %v963_v11 = vsel %vm962_vm13, %v1803_v0, %v959_v10  ;;  %v1163_v0 = vmul.f32 %v1805_v59, %v1161_v49 }
 0x62c   : > { %v965_v13 = vmul.f32 %v963_v11, %v931_v40  ;;  %1222 = vmatpush.bf16.msrb.mxu1 %v1639_v61 }
 0x62d   : > { %v1164_v3 = vmul.f32 %v1805_v59, %v1163_v0 }
 0x62e   : > { %v967_v15 = vmul.f32 %v965_v13, %v913_v8 }
 0x62f   : > { %v1165_v7 = vmul.f32 0.5, %v1164_v3 }
 0x630   : > { %v969_v17 = vadd.f32 %v967_v15, %v914_v14  ;;  %v1106_v14 = vld [vmem:[#allocation10 + $0x14] ss:$0 sm:$0xff] }
 0x631   : > { %v1166_v15 = vsub.f32 1.5, %v1165_v7 }
 0x632   : > { %v970_v18 = vpack.c.bf16 %v969_v17, %v968_v16 }
 0x633   : > { %v1167_v21 = vmul.f32 %v1805_v59, %v1166_v15 }
 0x634   : > { %1556 = vmatmul.msk.bf16.vlgmr.msrb.gmra.mxu3 %vm447_vm3, %v970_v18 }
 0x6b7   : > { %v1016_v23 = vpop.f32.mrf.mxu3 }
 0x6b8   : > { %v1017_v25 = vadd.f32 %v1016_v23, %v979_v24 }
 0x6ba   : > { %v1021_v28 = vmax.f32 %v1017_v25, 0.0 }
 0x6bf   : > { %v1018_v26 = vpop.f32.mrf.mxu3 }
 0x6c0   : > { %v1019_v27 = vadd.f32 %v1018_v26, %v979_v24  ;;  %v1171_v26 = vsel %vm1170_vm5, %v1805_v59, %v1167_v21 }
 0x6c2   : > { %v1022_v29 = vmax.f32 %v1019_v27, 0.0 }
 0x6c4   : > { %v1023_v30 = vpack.c.bf16 %v1022_v29, %v1021_v28 }
 0x6c6   : > { %1097 = vmatmul.bf16.vlgmr.msra.gmra.mxu0 %v1023_v30  ;;  %v1155_v30 = vld [vmem:[#allocation10 + $0x15] ss:$0 sm:$0xff] }
 0x743   : > { %v1098_v32 = vpop.f32.mrf.mxu0 }
 0x744   : > { %v1099_v33 = vadd.f32 %v1098_v32, %v1040_v31 }
 0x746   : > { %v1103_v9 = vadd.f32 %v1099_v33, %v968_v16 }
 0x748   : > { %v1107_v54 = vsel %vm447_vm3, %v1103_v9, 0.0 }
 0x749   : > { %1108 = vadd.xlane.f32.xlu0 %v1107_v54 }
 0x74b   : > { %v1100_v35 = vpop.f32.mrf.mxu0 }
 0x74c   : > { %v1101_v36 = vadd.f32 %v1100_v35, %v1040_v31 }
 0x74e   : > { %v1104_v37 = vadd.f32 %v1101_v36, %v969_v17 }
 0x750   : > { %v1110_v55 = vsel %vm447_vm3, %v1104_v37, 0.0 }
 0x751   : > { %1111 = vadd.xlane.f32.xlu2 %v1110_v55  ;;  %v1187_v55 = vld [vmem:[#allocation10 + $0x21] ss:$0 sm:$0xff] }
 0x7bc   : > { %v1109_v38 = vpop.xlane.xlu0 %1108 }
 0x7bd   : > { %v1113_v39 = vmul.f32 %v1109_v38, %v2328_v34 }
 0x7bf   : > { %v1115_v40 = vsub.f32 %v1103_v9, %v1113_v39  ;;  %v1156_v9 = vld [vmem:[#allocation10 + $0x16] ss:$0 sm:$0xff] }
 0x7c1   : > { %v1117_v41 = vmul.f32 %v1115_v40, %v1115_v40 }
 0x7c3   : > { %v1119_v42 = vsel %vm447_vm3, %v1117_v41, 0.0 }
 0x7c4   : > { %v1112_v43 = vpop.xlane.xlu2 %1111  ;;  %1120 = vadd.xlane.f32.xlu1 %v1119_v42 }
 0x7c5   : > { %v1114_v44 = vmul.f32 %v1112_v43, %v2328_v34 }
 0x7c7   : > { %v1116_v45 = vsub.f32 %v1104_v37, %v1114_v44 }
 0x7c9   : > { %v1118_v46 = vmul.f32 %v1116_v45, %v1116_v45 }
 0x7cb   : > { %v1122_v47 = vsel %vm447_vm3, %v1118_v46, 0.0 }
 0x7cc   : > { %1123 = vadd.xlane.f32.xlu0 %v1122_v47  ;;  %v1238_v47 = vld [vmem:[#allocation10 + $0x24] ss:$0 sm:$0xff] }
 0x837   : > { %v1121_v51 = vpop.xlane.xlu1 %1120 }
 0x838   : > { %v1125_v52 = vmul.f32 %v1121_v51, %v2328_v34 }
 0x83a   : > { %v1127_v53 = vadd.f32 1e-05, %v1125_v52 }
 0x83c   : > { %1806 = vrsqrt.f32 %v1127_v53  ;;  %vm1135_vm15 = vweird.f32 %v1127_v53 }
 0x83f   : > { %v1124_v58 = vpop.xlane.xlu0 %1123 }
 0x840   : > { %v1126_v60 = vmul.f32 %v1124_v58, %v2328_v34  ;;  %v1105_v34 = vld [vmem:[#allocation10 + $0x13] ss:$0 sm:$0xff] }
 0x842   : > { %v1807_v62 = vpop.eup %1806  ;;  %v1128_v63 = vadd.f32 1e-05, %v1126_v60 }
 0x843   : > { %v1130_v1 = vmul.f32 %v1807_v62, %v1127_v53  ;;  %vm1136_vm14 = vweird.f32 %v1807_v62 }
 0x844   : > { %1808 = vrsqrt.f32 %v1128_v63  ;;  %vm1137_vm0 = vmor %vm1135_vm15, %vm1136_vm14  ;;  %vm1145_vm6 = vweird.f32 %v1128_v63 }
 0x845   : > { %v1131_v2 = vmul.f32 %v1807_v62, %v1130_v1 }
 0x847   : > { %v1132_v4 = vmul.f32 0.5, %v1131_v2 }
 0x849   : > { %v1133_v5 = vsub.f32 1.5, %v1132_v4 }
 0x84a   : > { %v1809_v6 = vpop.eup %1808 }
 0x84b   : > { %v1134_v8 = vmul.f32 %v1807_v62, %v1133_v5  ;;  %v1140_v10 = vmul.f32 %v1809_v6, %v1128_v63  ;;  %vm1146_vm4 = vweird.f32 %v1809_v6 }
 0x84c   : > { %vm1147_vm7 = vmor %vm1145_vm6, %vm1146_vm4 }
 0x84d   : > { %v1138_v11 = vsel %vm1137_vm0, %v1807_v62, %v1134_v8  ;;  %v1141_v12 = vmul.f32 %v1809_v6, %v1140_v10 }
 0x84e   : > { %v1149_v13 = vmul.f32 %v1138_v11, %v1115_v40  ;;  %v1231_v40 = vld [vmem:[#allocation10 + $0x22] ss:$0 sm:$0xff] }
 0x84f   : > { %v1142_v16 = vmul.f32 0.5, %v1141_v12 }
 0x850   : > { %v1151_v17 = vmul.f32 %v1149_v13, %v1105_v34 }
 0x851   : > { %v1143_v18 = vsub.f32 1.5, %v1142_v16 }
 0x852   : > { %v1153_v19 = vadd.f32 %v1151_v17, %v1106_v14 }
 0x853   : > { %v1144_v22 = vmul.f32 %v1809_v6, %v1143_v18 }
 0x854   : > { %v1159_v24 = vsub.f32 %v1153_v19, %v1157_v20 }
 0x855   : > { %v1148_v23 = vsel %vm1147_vm7, %v1809_v6, %v1144_v22 }
 0x856   : > { %v1150_v25 = vmul.f32 %v1148_v23, %v1116_v45  ;;  %v1172_v28 = vmul.f32 %v1171_v26, %v1159_v24 }
 0x858   : > { %v1152_v27 = vmul.f32 %v1150_v25, %v1105_v34  ;;  %v1174_v33 = vmul.f32 %v1172_v28, %v1155_v30 }
 0x85a   : > { %v1154_v29 = vadd.f32 %v1152_v27, %v1106_v14  ;;  %v1176_v35 = vadd.f32 %v1174_v33, %v1156_v9 }
 0x85c   : > { %v1160_v31 = vsub.f32 %v1154_v29, %v1157_v20 }
 0x85e   : > { %v1173_v32 = vmul.f32 %v1171_v26, %v1160_v31 }
 0x860   : > { %v1175_v54 = vmul.f32 %v1173_v32, %v1155_v30  ;;  %v1290_v30 = vld [vmem:[#allocation10 + $0x23] ss:$0 sm:$0xff] }
 0x862   : > { %v1177_v36 = vadd.f32 %v1175_v54, %v1156_v9  ;;  %v1295_v9 = vld [vmem:[#allocation10 + $0x25] ss:$0 sm:$0xff] }
 0x864   : > { %v1178_v37 = vpack.c.bf16 %v1177_v36, %v1176_v35 }
 0x866   : > { %1605 = vmatmul.msk.bf16.vlgmr.msrb.gmra.mxu1 %vm447_vm3, %v1178_v37 }
 0x8e3   : > { %v1224_v38 = vpop.f32.mrf.mxu1 }
 0x8e4   : > { %v1225_v39 = vadd.f32 %v1224_v38, %v1187_v55 }
 0x8e6   : > { %v1229_v41 = vmax.f32 %v1225_v39, 0.0 }
 0x8e8   : > { %v1232_v42 = vmul.f32 %v1231_v40, %v1229_v41 }
 0x8ea   : > { %1234 = vadd.xlane.f32.xlu2 %v1232_v42 }
 0x8eb   : > { %v1226_v43 = vpop.f32.mrf.mxu1 }
 0x8ec   : > { %v1227_v44 = vadd.f32 %v1226_v43, %v1187_v55 }
 0x8ee   : > { %v1230_v45 = vmax.f32 %v1227_v44, 0.0 }
 0x8f0   : > { %v1233_v46 = vmul.f32 %v1231_v40, %v1230_v45 }
 0x8f2   : > { %1236 = vadd.xlane.f32.xlu1 %v1233_v46 }
 0x95d   : > { %v1235_v48 = vpop.xlane.xlu2 %1234 }
 0x95e   : > { %v1239_v49 = vadd.f32 %v1238_v47, %v1235_v48 }
 0x960   : > { %v1242_v52 = vsel %vm1241_vm8, %v1239_v49, -inf }
 0x965   : > { %v1237_v50 = vpop.xlane.xlu1 %1236 }
 0x966   : > { %v1240_v51 = vadd.f32 %v1238_v47, %v1237_v50 }
 0x968   : > { %v1243_v53 = vsel %vm1241_vm8, %v1240_v51, -inf }
 0x969   : > { %v1244_v56 = vmax.f32 %v1242_v52, %v1243_v53 }
 0x96b   : > { %v1245_v58 = vrot.slane %v1244_v56, 4 }
 0x96d   : > { %v1246_v59 = vmax.f32 %v1244_v56, %v1245_v58 }
 0x96f   : > { %v1247_v60 = vrot.slane %v1246_v59, 2 }
 0x971   : > { %v1248_v61 = vmax.f32 %v1246_v59, %v1247_v60 }
 0x973   : > { %v1249_v62 = vrot.slane %v1248_v61, 1 }
 0x975   : > { %v1250_v63 = vmax.f32 %v1248_v61, %v1249_v62 }
 0x977   : > { %v1251_v0 = vsub.f32 %v1239_v49, %v1250_v63  ;;  %v1252_v1 = vsub.f32 %v1240_v51, %v1250_v63 }
 0x979   : > { %v1253_v2 = vmul.f32 1.442695, %v1251_v0  ;;  %v1255_v3 = vmul.f32 1.442695, %v1252_v1 }
 0x97b   : > { %1810 = vpow2.f32 %v1253_v2 }
 0x97c   : > { %1812 = vpow2.f32 %v1255_v3 }
 0x981   : > { %v1811_v4 = vpop.eup %1810 }
 0x982   : > { %v1813_v5 = vpop.eup %1812  ;;  %v1257_v6 = vsel %vm1241_vm8, %v1811_v4, 0.0 }
 0x983   : > { %v1258_v7 = vsel %vm1241_vm8, %v1813_v5, 0.0 }
 0x984   : > { %v1259_v8 = vadd.f32 %v1258_v7, %v1257_v6 }
 0x986   : > { %v1260_v10 = vrot.slane %v1259_v8, 4 }
 0x988   : > { %v1261_v34 = vadd.f32 %v1260_v10, %v1259_v8 }
 0x98a   : > { %v1262_v11 = vrot.slane %v1261_v34, 2 }
 0x98c   : > { %v1263_v12 = vadd.f32 %v1262_v11, %v1261_v34 }
 0x98e   : > { %v1264_v13 = vrot.slane %v1263_v12, 1 }
 0x990   : > { %v1265_v14 = vadd.f32 %v1264_v13, %v1263_v12 }
 0x992   : > { %1814 = vrcp.f32 %v1265_v14 }
 0x998   : > { %v1815_v15 = vpop.eup %1814 }
 0x999   : > { %v1268_v16 = vmul.f32 %v1815_v15, %v1813_v5  ;;  %v1267_v17 = vmul.f32 %v1815_v15, %v1811_v4 }
 0x99b   : > { %1276 = vperm.xlu2 %1762, %v1268_v16   ;;  %1271 = vperm.xlu0 %1761, %v1267_v17  }
 0x9f5   : > { %v1277_v18 = vpop.permute.xlu2 %1276 }
 0x9f6   : > { %v1280_v19 = vmul.f32 %v1277_v18, %v1177_v36 }
 0x9f8   : > { %v1282_v22 = vsel %vm447_vm3, %v1280_v19, 0.0 }
 0xa0d   : > { %v1272_v20 = vpop.permute.xlu0 %1271 }
 0xa0e   : > { %v1279_v21 = vmul.f32 %v1272_v20, %v1176_v35 }
 0xa10   : > { %v1281_v23 = vsel %vm447_vm3, %v1279_v21, 0.0 }
 0xa11   : > { %v1283_v24 = vadd.f32 %v1282_v22, %v1281_v23 }
 0xa13   : > { %v1284_v25 = vrot.slane %v1283_v24, 4 }
 0xa15   : > { %v1285_v26 = vadd.f32 %v1284_v25, %v1283_v24 }
 0xa17   : > { %v1286_v27 = vrot.slane %v1285_v26, 2 }
 0xa19   : > { %v1287_v28 = vadd.f32 %v1286_v27, %v1285_v26 }
 0xa1b   : > { %v1288_v29 = vrot.slane %v1287_v28, 1 }
 0xa1d   : > { %v1289_v31 = vadd.f32 %v1288_v29, %v1287_v28 }
 0xa1f   : > { %v1291_v32 = vmul.f32 %v1290_v30, %v1289_v31 }
 0xa21   : > { %v1292_v33 = vsel %vm447_vm3, %v1291_v32, 0.0 }
 0xa22   : > { %1293 = vadd.xlane.f32.xlu1 %v1292_v33 }
 0xa95   : > { %v1294_v54 = vpop.xlane.xlu1 %1293 }
 0xa96   : > { %v1296_v36 = vadd.f32 %v1295_v9, %v1294_v54 }
 0xa98   : > { %v1297_v35 = vsub.f32 0.0, %v1296_v36 }
 0xa9a   : > { %v1298_v37 = vmul.f32 1.442695, %v1297_v35 }
 0xa9c   : > { %1816 = vpow2.f32 %v1298_v37 }
 0xaa2   : > { %v1817_v55 = vpop.eup %1816 }
 0xaa3   : > { %v1300_v38 = vadd.f32 1.0, %v1817_v55 }
 0xaa5   : > { %1818 = vrcp.f32 %v1300_v38  ;;  %v1312_v42 = vand.u32 2147483648, %v1300_v38  ;;  %v1310_v44 = vand.u32 2147483647, %v1300_v38  ;;  %vm1306_vm3 = vweird.f32 %v1300_v38 }
 0xaa7   : > { %v1313_v46 = vor.u32 1.1754944e-38, %v1312_v42  ;;  %vm1311_vm11 = vcmp.eq.f32.partialorder %v1310_v44, 8.507059e+37 }
 0xaab   : > { %v1819_v39 = vpop.eup %1818 }
 0xaac   : > { %v1302_v40 = vmul.f32 %v1819_v39, %v1300_v38  ;;  %vm1307_vm9 = vweird.f32 %v1819_v39 }
 0xaad   : > { %vm1308_vm10 = vmor %vm1306_vm3, %vm1307_vm9 }
 0xaae   : > { %v1303_v41 = vsub.f32 1.0, %v1302_v40 }
 0xab0   : > { %v1304_v43 = vmul.f32 %v1819_v39, %v1303_v41 }
 0xab2   : > { %v1305_v45 = vadd.f32 %v1819_v39, %v1304_v43 }
 0xab4   : > { %v1309_v47 = vsel %vm1308_vm10, %v1819_v39, %v1305_v45 }
 0xab5   : > { %v1314_v48 = vsel %vm1311_vm11, %v1313_v46, %v1309_v47 }
 0xab6   : > { %1318 = vperm.xlu1 %1763, %v1314_v48  }
 0xb28   : > { %v1319_v49 = vpop.permute.xlu1 %1318 }
 0xb29   : > { %1321 = vst [vmem:[%s381_s18] sm:$0xff] %v1319_v49 }
 0xb2a   : > { %1997 = shalt.err (!%p1994_p8)
}
 0xb2b   : > { %1663 = dma.vmem_to_hbm [thread:$0]  (%p2147_p5), %s1336_s25, 128, %s1338_s6, %s1323_s29  }
 0xb2c PF: > { %p1695_p9 = scmp.ge.s32.totalorder %s2044_s30, 2  ;;  %s1349_s20 = sand.u32 1, %s2032_s27  }
 0xb2d   : > { %s1350_s26 = scalar_lea.sflag [#allocation4], %s1349_s20 }
 0xb2e   : > { %p1682_p10 = pnand %p1695_p9, %p2151_p6 }
 0xb30   : > { %p1683_p11 = pneg %p1682_p10 }
 0xb32   : > { %2027 = dma.done.wait (%p1683_p11), %s1350_s26, 128  }
 0xb33   : > { %2029 = vsyncadd (%p1683_p11), %s1350_s26, 4294967168  ;;  %s2429_s13 = sld [smem:[#allocation16_spill]]  ;;  %p21_p12 = scmp.ge.s32.totalorder %s2134_s11, 4  }
 0xb34   : > { %s2430_s29 = sld [smem:[#allocation17_spill]]  ;;  %s2431_s27 = smov %s2036_s28 }
 0xb35   : > { %s2433_s30 = smov %s2134_s11  ;;  %23 = sbr.rel (!%p21_p12) target bundleno = 9 (0x9), region = 109 }
 0xb39   : > { %s2432_s28 = smov %s2429_s13 }
 0xb3a   :  { %1356 = vsyncpa [#allocation3], 1 }
 0xb3b   :  { %1358 = vsyncpa [#allocation3 + $0x1], 1 }
 0xb3c   :  { %1359 = vsyncpa [#allocation6], 1 }
 0xb3d   :  { %1360 = vsyncpa [#allocation9], 1 }
 0xb3e   :  { %1361 = vsyncpa [#allocation4], 1 }
 0xb3f   :  { %1363 = vsyncpa [#allocation4 + $0x1], 1 }

</bundles_post_ra>
